<compile_context>
chip_gen: v7x
topology: tpu7x:2x2x1
jax: 0.10.0
libtpu: 0.0.40
codegen_flags: <defaults>
</compile_context>

<pallas_src>
import math
from functools import partial

import jax
import jax.numpy as jnp
from jax import lax
from jax.experimental import pallas as pl
from jax.experimental.pallas import tpu as pltpu

INPUT_SIZE = 100
HIDDEN_SIZE = 100
OUTPUT_SIZE = 4

# Padded, lane-aligned sizes.
I_PAD = 128                  # input features padded to a full lane group
H_PAD = 128                  # hidden features padded
OUT_PAD = 128                # logits padded (lane-dense stores)
K_PAD = I_PAD + H_PAD        # 256: combined [x | h] contraction depth (one MXU tile deep)
N_PAD = H_PAD + OUT_PAD      # 256: fused output width [next hidden | logits]


def _make_rnn_kernel(tb, t_real):
    """Build the kernel for a fixed time-block size `tb` and true sequence length `t_real`."""

    def kernel(x_ref, h0_ref, w_ref, b_ref, out_ref, hid_ref, comb_scr):
        ti = pl.program_id(1)            # time-block index (sequential / "arbitrary")

        @pl.when(ti == 0)
        def _():
            # Load this batch block's initial hidden into the carry lanes.
            comb_scr[:, I_PAD:] = h0_ref[...]

        bp = comb_scr.shape[0]

        # Loop invariants hoisted out of the unrolled time loop.
        bias = jnp.broadcast_to(b_ref[...], (bp, N_PAD))
        lane = lax.broadcasted_iota(jnp.int32, (bp, OUT_PAD), 1)
        logit_mask = jnp.where(lane < OUTPUT_SIZE,
                               jnp.float32(0.0), jnp.float32(-1e30))

        t_base = ti * tb

        def step(i, carry):
            @pl.when(t_base + i < t_real)      # skip padded tail steps
            def _():
                # One K=256 matmul per step on the combined [x_t | h_{t-1}] slab.
                comb_scr[:, :I_PAD] = x_ref[i]
                y = jnp.dot(comb_scr[...], w_ref[...],
                            preferred_element_type=jnp.float32) + bias

                # Recurrent path first: commit h_t before the softmax work so the
                # serial h-chain never waits on EUP/XLU/stores.
                comb_scr[:, I_PAD:] = y[:, :H_PAD]

                # Numerically-stable log-softmax over the real logit lanes only.
                logits = y[:, H_PAD:] + logit_mask     # padded lanes -> -1e30
                m = jnp.max(logits, axis=-1, keepdims=True)
                shifted = logits - m
                lse = jnp.log(jnp.sum(jnp.exp(shifted), axis=-1, keepdims=True))
                out_ref[i] = (shifted - lse).astype(out_ref.dtype)
            return carry

        lax.fori_loop(0, tb, step, 0, unroll=True)

        # Write the running hidden out every grid step: a cheap VMEM store, and robust
        # against revisited-output writeback timing.
        hid_ref[...] = comb_scr[:, I_PAD:]

    return kernel


def pack_params(wh_t, bh, wo_t, bo):
    """Fuse the (pre-transposed) i2h / i2o weights into one K=256-deep, 256-wide slab.

    wh_t: [INPUT+HIDDEN, HIDDEN], wo_t: [INPUT+HIDDEN, OUTPUT], bh: [HIDDEN], bo: [OUTPUT].
    Returns w_f [K_PAD, N_PAD] (rows 0..127 = input half, 128..255 = hidden half;
    cols 0..127 = next hidden, 128..255 = logits) and b_f [1, N_PAD].
    """
    w_f = jnp.zeros((K_PAD, N_PAD), jnp.float32)
    w_f = w_f.at[:INPUT_SIZE, :HIDDEN_SIZE].set(wh_t[:INPUT_SIZE])
    w_f = w_f.at[:INPUT_SIZE, H_PAD:H_PAD + OUTPUT_SIZE].set(wo_t[:INPUT_SIZE])
    w_f = w_f.at[I_PAD:I_PAD + HIDDEN_SIZE, :HIDDEN_SIZE].set(wh_t[INPUT_SIZE:])
    w_f = w_f.at[I_PAD:I_PAD + HIDDEN_SIZE, H_PAD:H_PAD + OUTPUT_SIZE].set(wo_t[INPUT_SIZE:])

    b_f = jnp.zeros((1, N_PAD), jnp.float32)
    b_f = b_f.at[0, :HIDDEN_SIZE].set(bh.reshape(-1))
    b_f = b_f.at[0, H_PAD:H_PAD + OUTPUT_SIZE].set(bo.reshape(-1))
    return w_f, b_f


@partial(jax.jit, static_argnames=("tb",))
def rnn_forward_sequence(xs, hidden0, w_f, b_f, *, tb=8):
    """Run T RNN steps in one fused Pallas kernel.

    xs: [T, B, INPUT_SIZE], hidden0: [B, HIDDEN_SIZE]
    Returns (log_probs [T, B, OUTPUT_SIZE], final hidden [B, HIDDEN_SIZE]).
    """
    T, B, _ = xs.shape

    # Batch padding / batch-block size (fills MXU rows; parallel grid axis for megacore).
    b_pad = max(8, ((B + 7) // 8) * 8)
    if b_pad >= 128:
        bb = 128
        b_pad = ((b_pad + 127) // 128) * 128
    else:
        bb = b_pad
    nb = b_pad // bb

    # Time padding: each grid step processes `tb` fused RNN steps.
    t_pad = ((T + tb - 1) // tb) * tb
    nt = t_pad // tb

    xs_p = jnp.pad(xs.astype(jnp.float32),
                   ((0, t_pad - T), (0, b_pad - B), (0, I_PAD - INPUT_SIZE)))
    h0_p = jnp.pad(hidden0.astype(jnp.float32),
                   ((0, b_pad - B), (0, H_PAD - HIDDEN_SIZE)))

    grid_spec = pltpu.PrefetchScalarGridSpec(
        num_scalar_prefetch=0,
        grid=(nb, nt),
        in_specs=[
            pl.BlockSpec((tb, bb, I_PAD), lambda bi, ti: (ti, bi, 0)),    # x: streamed
            pl.BlockSpec((bb, H_PAD), lambda bi, ti: (bi, 0)),            # h0: per batch block
            pl.BlockSpec((K_PAD, N_PAD), lambda bi, ti: (0, 0)),          # fused weights: resident
            pl.BlockSpec((1, N_PAD), lambda bi, ti: (0, 0)),              # fused bias: resident
        ],
        out_specs=[
            pl.BlockSpec((tb, bb, OUT_PAD), lambda bi, ti: (ti, bi, 0)),  # per-step log-probs
            pl.BlockSpec((bb, H_PAD), lambda bi, ti: (bi, 0)),            # final hidden
        ],
        scratch_shapes=[pltpu.VMEM((bb, K_PAD), jnp.float32)],            # [x | h] carry slab
    )

    out_p, hid_p = pl.pallas_call(
        _make_rnn_kernel(tb, T),
        out_shape=(jax.ShapeDtypeStruct((t_pad, b_pad, OUT_PAD), jnp.float32),
                   jax.ShapeDtypeStruct((b_pad, H_PAD), jnp.float32)),
        grid_spec=grid_spec,
        compiler_params=pltpu.CompilerParams(
            dimension_semantics=("parallel", "arbitrary")),   # batch parallel, time serial
    )(xs_p, h0_p, w_f, b_f)

    # NOTE: this slice is a separate XLA op over the padded slab; skip / fuse into the
    # consumer if the padded layout is acceptable downstream.
    return out_p[:T, :B, :OUTPUT_SIZE], hid_p[:B, :HIDDEN_SIZE]


def rnn_step(x, hidden, w_f, b_f):
    """Single-step API matching RNN.forward(input, hidden) -> (output, hidden)."""
    out, h_new = rnn_forward_sequence(x[None], hidden, w_f, b_f, tb=1)
    return out[0], h_new


def init_params(key):
    """nn.Linear-style init: U(-1/sqrt(fan_in), 1/sqrt(fan_in)); weights pre-transposed."""
    k1, k2, k3, k4 = jax.random.split(key, 4)
    fan_in = INPUT_SIZE + HIDDEN_SIZE
    bound = 1.0 / math.sqrt(fan_in)
    wh_t = jax.random.uniform(k1, (fan_in, HIDDEN_SIZE), jnp.float32, -bound, bound)
    bh = jax.random.uniform(k2, (HIDDEN_SIZE,), jnp.float32, -bound, bound)
    wo_t = jax.random.uniform(k3, (fan_in, OUTPUT_SIZE), jnp.float32, -bound, bound)
    bo = jax.random.uniform(k4, (OUTPUT_SIZE,), jnp.float32, -bound, bound)
    return wh_t, bh, wo_t, bo


if __name__ == "__main__":
    key = jax.random.PRNGKey(0)
    k_in, k_par = jax.random.split(key)

    batch, seq_len = 2, 8
    xs = jax.random.normal(k_in, (seq_len, batch, INPUT_SIZE), jnp.float32)
    hidden0 = jnp.zeros((batch, HIDDEN_SIZE), jnp.float32)   # RNN.initHidden()

    wh_t, bh, wo_t, bo = init_params(k_par)
    w_f, b_f = pack_params(wh_t, bh, wo_t, bo)

    log_probs, hidden_T = rnn_forward_sequence(xs, hidden0, w_f, b_f, tb=8)
    jax.block_until_ready((log_probs, hidden_T))

    # Pure-JAX reference: step-by-step, exactly the PyTorch forward.
    def ref_step(x, h):
        comb = jnp.concatenate([x, h], axis=1)
        h_new = comb @ wh_t + bh
        logits = comb @ wo_t + bo
        return jax.nn.log_softmax(logits, axis=1), h_new

    ref_outs = []
    h = hidden0
    for t in range(seq_len):
        o, h = ref_step(xs[t], h)
        ref_outs.append(o)
    ref_outs = jnp.stack(ref_outs)

    assert jnp.allclose(log_probs, ref_outs, atol=1e-4, rtol=1e-4), "log_softmax mismatch"
    assert jnp.allclose(hidden_T, h, atol=1e-4, rtol=1e-4), "hidden mismatch"

    # Single-step parity with RNN.forward(input, hidden).
    out1, h1 = rnn_step(xs[0], hidden0, w_f, b_f)
    jax.block_until_ready((out1, h1))
    assert jnp.allclose(out1, ref_outs[0], atol=1e-4, rtol=1e-4), "single-step output mismatch"
    assert jnp.allclose(h1, ref_step(xs[0], hidden0)[1], atol=1e-4, rtol=1e-4), \
        "single-step hidden mismatch"

    print("KERNEL_OK")
</pallas_src>

<mosaic_0001>
module attributes {stable_mosaic.version = 11 : i64} {
  func.func @kernel(%arg0: i32, %arg1: i32, %arg2: memref<8x8x128xf32, #tpu.memory_space<vmem>>, %arg3: memref<8x128xf32, #tpu.memory_space<vmem>>, %arg4: memref<256x256xf32, #tpu.memory_space<vmem>>, %arg5: memref<1x256xf32, #tpu.memory_space<vmem>>, %arg6: memref<8x8x128xf32, #tpu.memory_space<vmem>>, %arg7: memref<8x128xf32, #tpu.memory_space<vmem>>, %arg8: memref<8x256xf32, #tpu.memory_space<vmem>>) attributes {dimension_semantics = [#tpu.dimension_semantics<parallel>, #tpu.dimension_semantics<arbitrary>], iteration_bounds = array<i64: 1, 1>, scalar_prefetch = 0 : i64, scratch_operands = 1 : i64, tpu.core_type = #tpu.core_type<tc>, window_params = [{transform_indices = @transform_0, window_bounds = array<i64: 8, 8, 128>}, {transform_indices = @transform_1, window_bounds = array<i64: 8, 128>}, {pipeline_mode = #tpu.pipeline_mode<synchronous>, transform_indices = @transform_2, window_bounds = array<i64: 256, 256>}, {pipeline_mode = #tpu.pipeline_mode<synchronous>, transform_indices = @transform_3, window_bounds = array<i64: 1, 256>}, {transform_indices = @transform_4, window_bounds = array<i64: 8, 8, 128>}, {transform_indices = @transform_5, window_bounds = array<i64: 8, 128>}]} {
    %c0_i32 = arith.constant 0 : i32
    %0 = arith.cmpi eq, %arg1, %c0_i32 : i32
    %1 = arith.extui %0 : i1 to i32
    %c0_i32_0 = arith.constant 0 : i32
    %2 = arith.cmpi ne, %1, %c0_i32_0 : i32
    scf.if %2 {
      %c0_25 = arith.constant 0 : index
      %c0_26 = arith.constant 0 : index
      %47 = vector.load %arg3[%c0_25, %c0_26] : memref<8x128xf32, #tpu.memory_space<vmem>>, vector<8x128xf32>
      %c0_27 = arith.constant 0 : index
      %c128_28 = arith.constant 128 : index
      %48 = vector.load %arg8[%c0_27, %c128_28] : memref<8x256xf32, #tpu.memory_space<vmem>>, vector<8x128xf32>
      tpu.vector_store %arg8[%c0_27, %c128_28], %47 {strides = array<i32>} : memref<8x256xf32, #tpu.memory_space<vmem>>, vector<8x128xf32>,
    } else {
    }
    %c0 = arith.constant 0 : index
    %c0_1 = arith.constant 0 : index
    %3 = vector.load %arg5[%c0, %c0_1] : memref<1x256xf32, #tpu.memory_space<vmem>>, vector<1x256xf32>
    %4 = vector.shape_cast %3 : vector<1x256xf32> to vector<1x256xf32>
    %5 = vector.broadcast %4 : vector<1x256xf32> to vector<8x256xf32>
    %6 = tpu.iota {dimensions = array<i32: 1>} : vector<8x128xi32>
    %c4_i32 = arith.constant 4 : i32
    %7 = vector.broadcast %c4_i32 : i32 to vector<8x128xi32>
    %8 = arith.cmpi slt, %6, %7 : vector<8x128xi32>
    %cst = arith.constant 0.000000e+00 : f32
    %cst_2 = arith.constant -1.000000e+30 : f32
    %9 = vector.broadcast %cst : f32 to vector<8x128xf32>
    %10 = vector.broadcast %cst_2 : f32 to vector<8x128xf32>
    %11 = arith.select %8, %9, %10 : vector<8x128xi1>, vector<8x128xf32>
    %c8_i32 = arith.constant 8 : i32
    %12 = arith.muli %arg1, %c8_i32 : i32
    %c0_i32_3 = arith.constant 0 : i32
    %13 = arith.addi %12, %c0_i32_3 : i32
    %c8_i32_4 = arith.constant 8 : i32
    %14 = arith.cmpi slt, %13, %c8_i32_4 : i32
    %15 = arith.extui %14 : i1 to i32
    %c0_i32_5 = arith.constant 0 : i32
    %16 = arith.cmpi ne, %15, %c0_i32_5 : i32
    scf.if %16 {
      %47 = arith.index_cast %c0_i32_3 : i32 to index
      %c0_25 = arith.constant 0 : index
      %c0_26 = arith.constant 0 : index
      %48 = vector.load %arg2[%47, %c0_25, %c0_26] : memref<8x8x128xf32, #tpu.memory_space<vmem>>, vector<1x8x128xf32>
      %49 = vector.shape_cast %48 : vector<1x8x128xf32> to vector<8x128xf32>
      %c0_27 = arith.constant 0 : index
      %c0_28 = arith.constant 0 : index
      %50 = vector.load %arg8[%c0_27, %c0_28] : memref<8x256xf32, #tpu.memory_space<vmem>>, vector<8x128xf32>
      tpu.vector_store %arg8[%c0_27, %c0_28], %49 {strides = array<i32>} : memref<8x256xf32, #tpu.memory_space<vmem>>, vector<8x128xf32>,
      %c0_29 = arith.constant 0 : index
      %c0_30 = arith.constant 0 : index
      %51 = vector.load %arg8[%c0_29, %c0_30] : memref<8x256xf32, #tpu.memory_space<vmem>>, vector<8x256xf32>
      %c0_31 = arith.constant 0 : index
      %c0_32 = arith.constant 0 : index
      %52 = vector.load %arg4[%c0_31, %c0_32] : memref<256x256xf32, #tpu.memory_space<vmem>>, vector<256x256xf32>
      %cst_33 = arith.constant dense<0.000000e+00> : vector<8x256xf32>
      %53 = tpu.matmul %51, %52, %cst_33 {dimension_numbers = #tpu.dot_dimension_numbers<[1], [0], [0], [1], [0, 0, 1, 1], [], []>} : vector<8x256xf32>, vector<256x256xf32>, vector<8x256xf32> -> vector<8x256xf32>
      %54 = arith.addf %53, %5 : vector<8x256xf32>
      %55 = vector.extract_strided_slice %54 {offsets = [0, 0], sizes = [8, 128], strides = [1, 1]} : vector<8x256xf32> to vector<8x128xf32>
      %c0_34 = arith.constant 0 : index
      %c128_35 = arith.constant 128 : index
      %56 = vector.load %arg8[%c0_34, %c128_35] : memref<8x256xf32, #tpu.memory_space<vmem>>, vector<8x128xf32>
      tpu.vector_store %arg8[%c0_34, %c128_35], %55 {strides = array<i32>} : memref<8x256xf32, #tpu.memory_space<vmem>>, vector<8x128xf32>,
      %57 = vector.extract_strided_slice %54 {offsets = [0, 128], sizes = [8, 128], strides = [1, 1]} : vector<8x256xf32> to vector<8x128xf32>
      %58 = arith.addf %57, %11 : vector<8x128xf32>
      %cst_36 = arith.constant dense<0xFF800000> : vector<8xf32>
      %59 = vector.multi_reduction <maximumf>, %58, %cst_36 [1] : vector<8x128xf32> to vector<8xf32>
      %60 = vector.shape_cast %59 : vector<8xf32> to vector<8x1xf32>
      %61 = vector.broadcast %60 : vector<8x1xf32> to vector<8x128xf32>
      %62 = arith.subf %58, %61 : vector<8x128xf32>
      %63 = math.exp %62 : vector<8x128xf32>
      %cst_37 = arith.constant dense<0.000000e+00> : vector<8xf32>
      %64 = vector.multi_reduction <add>, %63, %cst_37 [1] : vector<8x128xf32> to vector<8xf32>
      %65 = vector.shape_cast %64 : vector<8xf32> to vector<8x1xf32>
      %66 = math.log %65 : vector<8x1xf32>
      %67 = vector.broadcast %66 : vector<8x1xf32> to vector<8x128xf32>
      %68 = arith.subf %62, %67 : vector<8x128xf32>
      %69 = arith.index_cast %c0_i32_3 : i32 to index
      %c0_38 = arith.constant 0 : index
      %c0_39 = arith.constant 0 : index
      %70 = vector.load %arg6[%69, %c0_38, %c0_39] : memref<8x8x128xf32, #tpu.memory_space<vmem>>, vector<1x8x128xf32>
      %71 = vector.shape_cast %70 : vector<1x8x128xf32> to vector<8x128xf32>
      %72 = vector.shape_cast %68 : vector<8x128xf32> to vector<1x8x128xf32>
      tpu.vector_store %arg6[%69, %c0_38, %c0_39], %72 {strides = array<i32>} : memref<8x8x128xf32, #tpu.memory_space<vmem>>, vector<1x8x128xf32>,
    } else {
    }
    %c1_i32 = arith.constant 1 : i32
    %17 = arith.addi %12, %c1_i32 : i32
    %c8_i32_6 = arith.constant 8 : i32
    %18 = arith.cmpi slt, %17, %c8_i32_6 : i32
    %19 = arith.extui %18 : i1 to i32
    %c0_i32_7 = arith.constant 0 : i32
    %20 = arith.cmpi ne, %19, %c0_i32_7 : i32
    scf.if %20 {
      %47 = arith.index_cast %c1_i32 : i32 to index
      %c0_25 = arith.constant 0 : index
      %c0_26 = arith.constant 0 : index
      %48 = vector.load %arg2[%47, %c0_25, %c0_26] : memref<8x8x128xf32, #tpu.memory_space<vmem>>, vector<1x8x128xf32>
      %49 = vector.shape_cast %48 : vector<1x8x128xf32> to vector<8x128xf32>
      %c0_27 = arith.constant 0 : index
      %c0_28 = arith.constant 0 : index
      %50 = vector.load %arg8[%c0_27, %c0_28] : memref<8x256xf32, #tpu.memory_space<vmem>>, vector<8x128xf32>
      tpu.vector_store %arg8[%c0_27, %c0_28], %49 {strides = array<i32>} : memref<8x256xf32, #tpu.memory_space<vmem>>, vector<8x128xf32>,
      %c0_29 = arith.constant 0 : index
      %c0_30 = arith.constant 0 : index
      %51 = vector.load %arg8[%c0_29, %c0_30] : memref<8x256xf32, #tpu.memory_space<vmem>>, vector<8x256xf32>
      %c0_31 = arith.constant 0 : index
      %c0_32 = arith.constant 0 : index
      %52 = vector.load %arg4[%c0_31, %c0_32] : memref<256x256xf32, #tpu.memory_space<vmem>>, vector<256x256xf32>
      %cst_33 = arith.constant dense<0.000000e+00> : vector<8x256xf32>
      %53 = tpu.matmul %51, %52, %cst_33 {dimension_numbers = #tpu.dot_dimension_numbers<[1], [0], [0], [1], [0, 0, 1, 1], [], []>} : vector<8x256xf32>, vector<256x256xf32>, vector<8x256xf32> -> vector<8x256xf32>
      %54 = arith.addf %53, %5 : vector<8x256xf32>
      %55 = vector.extract_strided_slice %54 {offsets = [0, 0], sizes = [8, 128], strides = [1, 1]} : vector<8x256xf32> to vector<8x128xf32>
      %c0_34 = arith.constant 0 : index
      %c128_35 = arith.constant 128 : index
      %56 = vector.load %arg8[%c0_34, %c128_35] : memref<8x256xf32, #tpu.memory_space<vmem>>, vector<8x128xf32>
      tpu.vector_store %arg8[%c0_34, %c128_35], %55 {strides = array<i32>} : memref<8x256xf32, #tpu.memory_space<vmem>>, vector<8x128xf32>,
      %57 = vector.extract_strided_slice %54 {offsets = [0, 128], sizes = [8, 128], strides = [1, 1]} : vector<8x256xf32> to vector<8x128xf32>
      %58 = arith.addf %57, %11 : vector<8x128xf32>
      %cst_36 = arith.constant dense<0xFF800000> : vector<8xf32>
      %59 = vector.multi_reduction <maximumf>, %58, %cst_36 [1] : vector<8x128xf32> to vector<8xf32>
      %60 = vector.shape_cast %59 : vector<8xf32> to vector<8x1xf32>
      %61 = vector.broadcast %60 : vector<8x1xf32> to vector<8x128xf32>
      %62 = arith.subf %58, %61 : vector<8x128xf32>
      %63 = math.exp %62 : vector<8x128xf32>
      %cst_37 = arith.constant dense<0.000000e+00> : vector<8xf32>
      %64 = vector.multi_reduction <add>, %63, %cst_37 [1] : vector<8x128xf32> to vector<8xf32>
      %65 = vector.shape_cast %64 : vector<8xf32> to vector<8x1xf32>
      %66 = math.log %65 : vector<8x1xf32>
      %67 = vector.broadcast %66 : vector<8x1xf32> to vector<8x128xf32>
      %68 = arith.subf %62, %67 : vector<8x128xf32>
      %69 = arith.index_cast %c1_i32 : i32 to index
      %c0_38 = arith.constant 0 : index
      %c0_39 = arith.constant 0 : index
      %70 = vector.load %arg6[%69, %c0_38, %c0_39] : memref<8x8x128xf32, #tpu.memory_space<vmem>>, vector<1x8x128xf32>
      %71 = vector.shape_cast %70 : vector<1x8x128xf32> to vector<8x128xf32>
      %72 = vector.shape_cast %68 : vector<8x128xf32> to vector<1x8x128xf32>
      tpu.vector_store %arg6[%69, %c0_38, %c0_39], %72 {strides = array<i32>} : memref<8x8x128xf32, #tpu.memory_space<vmem>>, vector<1x8x128xf32>,
    } else {
    }
    %c2_i32 = arith.constant 2 : i32
    %21 = arith.addi %12, %c2_i32 : i32
    %c8_i32_8 = arith.constant 8 : i32
    %22 = arith.cmpi slt, %21, %c8_i32_8 : i32
    %23 = arith.extui %22 : i1 to i32
    %c0_i32_9 = arith.constant 0 : i32
    %24 = arith.cmpi ne, %23, %c0_i32_9 : i32
    scf.if %24 {
      %47 = arith.index_cast %c2_i32 : i32 to index
      %c0_25 = arith.constant 0 : index
      %c0_26 = arith.constant 0 : index
      %48 = vector.load %arg2[%47, %c0_25, %c0_26] : memref<8x8x128xf32, #tpu.memory_space<vmem>>, vector<1x8x128xf32>
      %49 = vector.shape_cast %48 : vector<1x8x128xf32> to vector<8x128xf32>
      %c0_27 = arith.constant 0 : index
      %c0_28 = arith.constant 0 : index
      %50 = vector.load %arg8[%c0_27, %c0_28] : memref<8x256xf32, #tpu.memory_space<vmem>>, vector<8x128xf32>
      tpu.vector_store %arg8[%c0_27, %c0_28], %49 {strides = array<i32>} : memref<8x256xf32, #tpu.memory_space<vmem>>, vector<8x128xf32>,
      %c0_29 = arith.constant 0 : index
      %c0_30 = arith.constant 0 : index
      %51 = vector.load %arg8[%c0_29, %c0_30] : memref<8x256xf32, #tpu.memory_space<vmem>>, vector<8x256xf32>
      %c0_31 = arith.constant 0 : index
      %c0_32 = arith.constant 0 : index
      %52 = vector.load %arg4[%c0_31, %c0_32] : memref<256x256xf32, #tpu.memory_space<vmem>>, vector<256x256xf32>
      %cst_33 = arith.constant dense<0.000000e+00> : vector<8x256xf32>
      %53 = tpu.matmul %51, %52, %cst_33 {dimension_numbers = #tpu.dot_dimension_numbers<[1], [0], [0], [1], [0, 0, 1, 1], [], []>} : vector<8x256xf32>, vector<256x256xf32>, vector<8x256xf32> -> vector<8x256xf32>
      %54 = arith.addf %53, %5 : vector<8x256xf32>
      %55 = vector.extract_strided_slice %54 {offsets = [0, 0], sizes = [8, 128], strides = [1, 1]} : vector<8x256xf32> to vector<8x128xf32>
      %c0_34 = arith.constant 0 : index
      %c128_35 = arith.constant 128 : index
      %56 = vector.load %arg8[%c0_34, %c128_35] : memref<8x256xf32, #tpu.memory_space<vmem>>, vector<8x128xf32>
      tpu.vector_store %arg8[%c0_34, %c128_35], %55 {strides = array<i32>} : memref<8x256xf32, #tpu.memory_space<vmem>>, vector<8x128xf32>,
      %57 = vector.extract_strided_slice %54 {offsets = [0, 128], sizes = [8, 128], strides = [1, 1]} : vector<8x256xf32> to vector<8x128xf32>
      %58 = arith.addf %57, %11 : vector<8x128xf32>
      %cst_36 = arith.constant dense<0xFF800000> : vector<8xf32>
      %59 = vector.multi_reduction <maximumf>, %58, %cst_36 [1] : vector<8x128xf32> to vector<8xf32>
      %60 = vector.shape_cast %59 : vector<8xf32> to vector<8x1xf32>
      %61 = vector.broadcast %60 : vector<8x1xf32> to vector<8x128xf32>
      %62 = arith.subf %58, %61 : vector<8x128xf32>
      %63 = math.exp %62 : vector<8x128xf32>
      %cst_37 = arith.constant dense<0.000000e+00> : vector<8xf32>
      %64 = vector.multi_reduction <add>, %63, %cst_37 [1] : vector<8x128xf32> to vector<8xf32>
      %65 = vector.shape_cast %64 : vector<8xf32> to vector<8x1xf32>
      %66 = math.log %65 : vector<8x1xf32>
      %67 = vector.broadcast %66 : vector<8x1xf32> to vector<8x128xf32>
      %68 = arith.subf %62, %67 : vector<8x128xf32>
      %69 = arith.index_cast %c2_i32 : i32 to index
      %c0_38 = arith.constant 0 : index
      %c0_39 = arith.constant 0 : index
      %70 = vector.load %arg6[%69, %c0_38, %c0_39] : memref<8x8x128xf32, #tpu.memory_space<vmem>>, vector<1x8x128xf32>
      %71 = vector.shape_cast %70 : vector<1x8x128xf32> to vector<8x128xf32>
      %72 = vector.shape_cast %68 : vector<8x128xf32> to vector<1x8x128xf32>
      tpu.vector_store %arg6[%69, %c0_38, %c0_39], %72 {strides = array<i32>} : memref<8x8x128xf32, #tpu.memory_space<vmem>>, vector<1x8x128xf32>,
    } else {
    }
    %c3_i32 = arith.constant 3 : i32
    %25 = arith.addi %12, %c3_i32 : i32
    %c8_i32_10 = arith.constant 8 : i32
    %26 = arith.cmpi slt, %25, %c8_i32_10 : i32
    %27 = arith.extui %26 : i1 to i32
    %c0_i32_11 = arith.constant 0 : i32
    %28 = arith.cmpi ne, %27, %c0_i32_11 : i32
    scf.if %28 {
      %47 = arith.index_cast %c3_i32 : i32 to index
      %c0_25 = arith.constant 0 : index
      %c0_26 = arith.constant 0 : index
      %48 = vector.load %arg2[%47, %c0_25, %c0_26] : memref<8x8x128xf32, #tpu.memory_space<vmem>>, vector<1x8x128xf32>
      %49 = vector.shape_cast %48 : vector<1x8x128xf32> to vector<8x128xf32>
      %c0_27 = arith.constant 0 : index
      %c0_28 = arith.constant 0 : index
      %50 = vector.load %arg8[%c0_27, %c0_28] : memref<8x256xf32, #tpu.memory_space<vmem>>, vector<8x128xf32>
      tpu.vector_store %arg8[%c0_27, %c0_28], %49 {strides = array<i32>} : memref<8x256xf32, #tpu.memory_space<vmem>>, vector<8x128xf32>,
      %c0_29 = arith.constant 0 : index
      %c0_30 = arith.constant 0 : index
      %51 = vector.load %arg8[%c0_29, %c0_30] : memref<8x256xf32, #tpu.memory_space<vmem>>, vector<8x256xf32>
      %c0_31 = arith.constant 0 : index
      %c0_32 = arith.constant 0 : index
      %52 = vector.load %arg4[%c0_31, %c0_32] : memref<256x256xf32, #tpu.memory_space<vmem>>, vector<256x256xf32>
      %cst_33 = arith.constant dense<0.000000e+00> : vector<8x256xf32>
      %53 = tpu.matmul %51, %52, %cst_33 {dimension_numbers = #tpu.dot_dimension_numbers<[1], [0], [0], [1], [0, 0, 1, 1], [], []>} : vector<8x256xf32>, vector<256x256xf32>, vector<8x256xf32> -> vector<8x256xf32>
      %54 = arith.addf %53, %5 : vector<8x256xf32>
      %55 = vector.extract_strided_slice %54 {offsets = [0, 0], sizes = [8, 128], strides = [1, 1]} : vector<8x256xf32> to vector<8x128xf32>
      %c0_34 = arith.constant 0 : index
      %c128_35 = arith.constant 128 : index
      %56 = vector.load %arg8[%c0_34, %c128_35] : memref<8x256xf32, #tpu.memory_space<vmem>>, vector<8x128xf32>
      tpu.vector_store %arg8[%c0_34, %c128_35], %55 {strides = array<i32>} : memref<8x256xf32, #tpu.memory_space<vmem>>, vector<8x128xf32>,
      %57 = vector.extract_strided_slice %54 {offsets = [0, 128], sizes = [8, 128], strides = [1, 1]} : vector<8x256xf32> to vector<8x128xf32>
      %58 = arith.addf %57, %11 : vector<8x128xf32>
      %cst_36 = arith.constant dense<0xFF800000> : vector<8xf32>
      %59 = vector.multi_reduction <maximumf>, %58, %cst_36 [1] : vector<8x128xf32> to vector<8xf32>
      %60 = vector.shape_cast %59 : vector<8xf32> to vector<8x1xf32>
      %61 = vector.broadcast %60 : vector<8x1xf32> to vector<8x128xf32>
      %62 = arith.subf %58, %61 : vector<8x128xf32>
      %63 = math.exp %62 : vector<8x128xf32>
      %cst_37 = arith.constant dense<0.000000e+00> : vector<8xf32>
      %64 = vector.multi_reduction <add>, %63, %cst_37 [1] : vector<8x128xf32> to vector<8xf32>
      %65 = vector.shape_cast %64 : vector<8xf32> to vector<8x1xf32>
      %66 = math.log %65 : vector<8x1xf32>
      %67 = vector.broadcast %66 : vector<8x1xf32> to vector<8x128xf32>
      %68 = arith.subf %62, %67 : vector<8x128xf32>
      %69 = arith.index_cast %c3_i32 : i32 to index
      %c0_38 = arith.constant 0 : index
      %c0_39 = arith.constant 0 : index
      %70 = vector.load %arg6[%69, %c0_38, %c0_39] : memref<8x8x128xf32, #tpu.memory_space<vmem>>, vector<1x8x128xf32>
      %71 = vector.shape_cast %70 : vector<1x8x128xf32> to vector<8x128xf32>
      %72 = vector.shape_cast %68 : vector<8x128xf32> to vector<1x8x128xf32>
      tpu.vector_store %arg6[%69, %c0_38, %c0_39], %72 {strides = array<i32>} : memref<8x8x128xf32, #tpu.memory_space<vmem>>, vector<1x8x128xf32>,
    } else {
    }
    %c4_i32_12 = arith.constant 4 : i32
    %29 = arith.addi %12, %c4_i32_12 : i32
    %c8_i32_13 = arith.constant 8 : i32
    %30 = arith.cmpi slt, %29, %c8_i32_13 : i32
    %31 = arith.extui %30 : i1 to i32
    %c0_i32_14 = arith.constant 0 : i32
    %32 = arith.cmpi ne, %31, %c0_i32_14 : i32
    scf.if %32 {
      %47 = arith.index_cast %c4_i32_12 : i32 to index
      %c0_25 = arith.constant 0 : index
      %c0_26 = arith.constant 0 : index
      %48 = vector.load %arg2[%47, %c0_25, %c0_26] : memref<8x8x128xf32, #tpu.memory_space<vmem>>, vector<1x8x128xf32>
      %49 = vector.shape_cast %48 : vector<1x8x128xf32> to vector<8x128xf32>
      %c0_27 = arith.constant 0 : index
      %c0_28 = arith.constant 0 : index
      %50 = vector.load %arg8[%c0_27, %c0_28] : memref<8x256xf32, #tpu.memory_space<vmem>>, vector<8x128xf32>
      tpu.vector_store %arg8[%c0_27, %c0_28], %49 {strides = array<i32>} : memref<8x256xf32, #tpu.memory_space<vmem>>, vector<8x128xf32>,
      %c0_29 = arith.constant 0 : index
      %c0_30 = arith.constant 0 : index
      %51 = vector.load %arg8[%c0_29, %c0_30] : memref<8x256xf32, #tpu.memory_space<vmem>>, vector<8x256xf32>
      %c0_31 = arith.constant 0 : index
      %c0_32 = arith.constant 0 : index
      %52 = vector.load %arg4[%c0_31, %c0_32] : memref<256x256xf32, #tpu.memory_space<vmem>>, vector<256x256xf32>
      %cst_33 = arith.constant dense<0.000000e+00> : vector<8x256xf32>
      %53 = tpu.matmul %51, %52, %cst_33 {dimension_numbers = #tpu.dot_dimension_numbers<[1], [0], [0], [1], [0, 0, 1, 1], [], []>} : vector<8x256xf32>, vector<256x256xf32>, vector<8x256xf32> -> vector<8x256xf32>
      %54 = arith.addf %53, %5 : vector<8x256xf32>
      %55 = vector.extract_strided_slice %54 {offsets = [0, 0], sizes = [8, 128], strides = [1, 1]} : vector<8x256xf32> to vector<8x128xf32>
      %c0_34 = arith.constant 0 : index
      %c128_35 = arith.constant 128 : index
      %56 = vector.load %arg8[%c0_34, %c128_35] : memref<8x256xf32, #tpu.memory_space<vmem>>, vector<8x128xf32>
      tpu.vector_store %arg8[%c0_34, %c128_35], %55 {strides = array<i32>} : memref<8x256xf32, #tpu.memory_space<vmem>>, vector<8x128xf32>,
      %57 = vector.extract_strided_slice %54 {offsets = [0, 128], sizes = [8, 128], strides = [1, 1]} : vector<8x256xf32> to vector<8x128xf32>
      %58 = arith.addf %57, %11 : vector<8x128xf32>
      %cst_36 = arith.constant dense<0xFF800000> : vector<8xf32>
      %59 = vector.multi_reduction <maximumf>, %58, %cst_36 [1] : vector<8x128xf32> to vector<8xf32>
      %60 = vector.shape_cast %59 : vector<8xf32> to vector<8x1xf32>
      %61 = vector.broadcast %60 : vector<8x1xf32> to vector<8x128xf32>
      %62 = arith.subf %58, %61 : vector<8x128xf32>
      %63 = math.exp %62 : vector<8x128xf32>
      %cst_37 = arith.constant dense<0.000000e+00> : vector<8xf32>
      %64 = vector.multi_reduction <add>, %63, %cst_37 [1] : vector<8x128xf32> to vector<8xf32>
      %65 = vector.shape_cast %64 : vector<8xf32> to vector<8x1xf32>
      %66 = math.log %65 : vector<8x1xf32>
      %67 = vector.broadcast %66 : vector<8x1xf32> to vector<8x128xf32>
      %68 = arith.subf %62, %67 : vector<8x128xf32>
      %69 = arith.index_cast %c4_i32_12 : i32 to index
      %c0_38 = arith.constant 0 : index
      %c0_39 = arith.constant 0 : index
      %70 = vector.load %arg6[%69, %c0_38, %c0_39] : memref<8x8x128xf32, #tpu.memory_space<vmem>>, vector<1x8x128xf32>
      %71 = vector.shape_cast %70 : vector<1x8x128xf32> to vector<8x128xf32>
      %72 = vector.shape_cast %68 : vector<8x128xf32> to vector<1x8x128xf32>
      tpu.vector_store %arg6[%69, %c0_38, %c0_39], %72 {strides = array<i32>} : memref<8x8x128xf32, #tpu.memory_space<vmem>>, vector<1x8x128xf32>,
    } else {
    }
    %c5_i32 = arith.constant 5 : i32
    %33 = arith.addi %12, %c5_i32 : i32
    %c8_i32_15 = arith.constant 8 : i32
    %34 = arith.cmpi slt, %33, %c8_i32_15 : i32
    %35 = arith.extui %34 : i1 to i32
    %c0_i32_16 = arith.constant 0 : i32
    %36 = arith.cmpi ne, %35, %c0_i32_16 : i32
    scf.if %36 {
      %47 = arith.index_cast %c5_i32 : i32 to index
      %c0_25 = arith.constant 0 : index
      %c0_26 = arith.constant 0 : index
      %48 = vector.load %arg2[%47, %c0_25, %c0_26] : memref<8x8x128xf32, #tpu.memory_space<vmem>>, vector<1x8x128xf32>
      %49 = vector.shape_cast %48 : vector<1x8x128xf32> to vector<8x128xf32>
      %c0_27 = arith.constant 0 : index
      %c0_28 = arith.constant 0 : index
      %50 = vector.load %arg8[%c0_27, %c0_28] : memref<8x256xf32, #tpu.memory_space<vmem>>, vector<8x128xf32>
      tpu.vector_store %arg8[%c0_27, %c0_28], %49 {strides = array<i32>} : memref<8x256xf32, #tpu.memory_space<vmem>>, vector<8x128xf32>,
      %c0_29 = arith.constant 0 : index
      %c0_30 = arith.constant 0 : index
      %51 = vector.load %arg8[%c0_29, %c0_30] : memref<8x256xf32, #tpu.memory_space<vmem>>, vector<8x256xf32>
      %c0_31 = arith.constant 0 : index
      %c0_32 = arith.constant 0 : index
      %52 = vector.load %arg4[%c0_31, %c0_32] : memref<256x256xf32, #tpu.memory_space<vmem>>, vector<256x256xf32>
      %cst_33 = arith.constant dense<0.000000e+00> : vector<8x256xf32>
      %53 = tpu.matmul %51, %52, %cst_33 {dimension_numbers = #tpu.dot_dimension_numbers<[1], [0], [0], [1], [0, 0, 1, 1], [], []>} : vector<8x256xf32>, vector<256x256xf32>, vector<8x256xf32> -> vector<8x256xf32>
      %54 = arith.addf %53, %5 : vector<8x256xf32>
      %55 = vector.extract_strided_slice %54 {offsets = [0, 0], sizes = [8, 128], strides = [1, 1]} : vector<8x256xf32> to vector<8x128xf32>
      %c0_34 = arith.constant 0 : index
      %c128_35 = arith.constant 128 : index
      %56 = vector.load %arg8[%c0_34, %c128_35] : memref<8x256xf32, #tpu.memory_space<vmem>>, vector<8x128xf32>
      tpu.vector_store %arg8[%c0_34, %c128_35], %55 {strides = array<i32>} : memref<8x256xf32, #tpu.memory_space<vmem>>, vector<8x128xf32>,
      %57 = vector.extract_strided_slice %54 {offsets = [0, 128], sizes = [8, 128], strides = [1, 1]} : vector<8x256xf32> to vector<8x128xf32>
      %58 = arith.addf %57, %11 : vector<8x128xf32>
      %cst_36 = arith.constant dense<0xFF800000> : vector<8xf32>
      %59 = vector.multi_reduction <maximumf>, %58, %cst_36 [1] : vector<8x128xf32> to vector<8xf32>
      %60 = vector.shape_cast %59 : vector<8xf32> to vector<8x1xf32>
      %61 = vector.broadcast %60 : vector<8x1xf32> to vector<8x128xf32>
      %62 = arith.subf %58, %61 : vector<8x128xf32>
      %63 = math.exp %62 : vector<8x128xf32>
      %cst_37 = arith.constant dense<0.000000e+00> : vector<8xf32>
      %64 = vector.multi_reduction <add>, %63, %cst_37 [1] : vector<8x128xf32> to vector<8xf32>
      %65 = vector.shape_cast %64 : vector<8xf32> to vector<8x1xf32>
      %66 = math.log %65 : vector<8x1xf32>
      %67 = vector.broadcast %66 : vector<8x1xf32> to vector<8x128xf32>
      %68 = arith.subf %62, %67 : vector<8x128xf32>
      %69 = arith.index_cast %c5_i32 : i32 to index
      %c0_38 = arith.constant 0 : index
      %c0_39 = arith.constant 0 : index
      %70 = vector.load %arg6[%69, %c0_38, %c0_39] : memref<8x8x128xf32, #tpu.memory_space<vmem>>, vector<1x8x128xf32>
      %71 = vector.shape_cast %70 : vector<1x8x128xf32> to vector<8x128xf32>
      %72 = vector.shape_cast %68 : vector<8x128xf32> to vector<1x8x128xf32>
      tpu.vector_store %arg6[%69, %c0_38, %c0_39], %72 {strides = array<i32>} : memref<8x8x128xf32, #tpu.memory_space<vmem>>, vector<1x8x128xf32>,
    } else {
    }
    %c6_i32 = arith.constant 6 : i32
    %37 = arith.addi %12, %c6_i32 : i32
    %c8_i32_17 = arith.constant 8 : i32
    %38 = arith.cmpi slt, %37, %c8_i32_17 : i32
    %39 = arith.extui %38 : i1 to i32
    %c0_i32_18 = arith.constant 0 : i32
    %40 = arith.cmpi ne, %39, %c0_i32_18 : i32
    scf.if %40 {
      %47 = arith.index_cast %c6_i32 : i32 to index
      %c0_25 = arith.constant 0 : index
      %c0_26 = arith.constant 0 : index
      %48 = vector.load %arg2[%47, %c0_25, %c0_26] : memref<8x8x128xf32, #tpu.memory_space<vmem>>, vector<1x8x128xf32>
      %49 = vector.shape_cast %48 : vector<1x8x128xf32> to vector<8x128xf32>
      %c0_27 = arith.constant 0 : index
      %c0_28 = arith.constant 0 : index
      %50 = vector.load %arg8[%c0_27, %c0_28] : memref<8x256xf32, #tpu.memory_space<vmem>>, vector<8x128xf32>
      tpu.vector_store %arg8[%c0_27, %c0_28], %49 {strides = array<i32>} : memref<8x256xf32, #tpu.memory_space<vmem>>, vector<8x128xf32>,
      %c0_29 = arith.constant 0 : index
      %c0_30 = arith.constant 0 : index
      %51 = vector.load %arg8[%c0_29, %c0_30] : memref<8x256xf32, #tpu.memory_space<vmem>>, vector<8x256xf32>
      %c0_31 = arith.constant 0 : index
      %c0_32 = arith.constant 0 : index
      %52 = vector.load %arg4[%c0_31, %c0_32] : memref<256x256xf32, #tpu.memory_space<vmem>>, vector<256x256xf32>
      %cst_33 = arith.constant dense<0.000000e+00> : vector<8x256xf32>
      %53 = tpu.matmul %51, %52, %cst_33 {dimension_numbers = #tpu.dot_dimension_numbers<[1], [0], [0], [1], [0, 0, 1, 1], [], []>} : vector<8x256xf32>, vector<256x256xf32>, vector<8x256xf32> -> vector<8x256xf32>
      %54 = arith.addf %53, %5 : vector<8x256xf32>
      %55 = vector.extract_strided_slice %54 {offsets = [0, 0], sizes = [8, 128], strides = [1, 1]} : vector<8x256xf32> to vector<8x128xf32>
      %c0_34 = arith.constant 0 : index
      %c128_35 = arith.constant 128 : index
      %56 = vector.load %arg8[%c0_34, %c128_35] : memref<8x256xf32, #tpu.memory_space<vmem>>, vector<8x128xf32>
      tpu.vector_store %arg8[%c0_34, %c128_35], %55 {strides = array<i32>} : memref<8x256xf32, #tpu.memory_space<vmem>>, vector<8x128xf32>,
      %57 = vector.extract_strided_slice %54 {offsets = [0, 128], sizes = [8, 128], strides = [1, 1]} : vector<8x256xf32> to vector<8x128xf32>
      %58 = arith.addf %57, %11 : vector<8x128xf32>
      %cst_36 = arith.constant dense<0xFF800000> : vector<8xf32>
      %59 = vector.multi_reduction <maximumf>, %58, %cst_36 [1] : vector<8x128xf32> to vector<8xf32>
      %60 = vector.shape_cast %59 : vector<8xf32> to vector<8x1xf32>
      %61 = vector.broadcast %60 : vector<8x1xf32> to vector<8x128xf32>
      %62 = arith.subf %58, %61 : vector<8x128xf32>
      %63 = math.exp %62 : vector<8x128xf32>
      %cst_37 = arith.constant dense<0.000000e+00> : vector<8xf32>
      %64 = vector.multi_reduction <add>, %63, %cst_37 [1] : vector<8x128xf32> to vector<8xf32>
      %65 = vector.shape_cast %64 : vector<8xf32> to vector<8x1xf32>
      %66 = math.log %65 : vector<8x1xf32>
      %67 = vector.broadcast %66 : vector<8x1xf32> to vector<8x128xf32>
      %68 = arith.subf %62, %67 : vector<8x128xf32>
      %69 = arith.index_cast %c6_i32 : i32 to index
      %c0_38 = arith.constant 0 : index
      %c0_39 = arith.constant 0 : index
      %70 = vector.load %arg6[%69, %c0_38, %c0_39] : memref<8x8x128xf32, #tpu.memory_space<vmem>>, vector<1x8x128xf32>
      %71 = vector.shape_cast %70 : vector<1x8x128xf32> to vector<8x128xf32>
      %72 = vector.shape_cast %68 : vector<8x128xf32> to vector<1x8x128xf32>
      tpu.vector_store %arg6[%69, %c0_38, %c0_39], %72 {strides = array<i32>} : memref<8x8x128xf32, #tpu.memory_space<vmem>>, vector<1x8x128xf32>,
    } else {
    }
    %c7_i32 = arith.constant 7 : i32
    %41 = arith.addi %12, %c7_i32 : i32
    %c8_i32_19 = arith.constant 8 : i32
    %42 = arith.cmpi slt, %41, %c8_i32_19 : i32
    %43 = arith.extui %42 : i1 to i32
    %c0_i32_20 = arith.constant 0 : i32
    %44 = arith.cmpi ne, %43, %c0_i32_20 : i32
    scf.if %44 {
      %47 = arith.index_cast %c7_i32 : i32 to index
      %c0_25 = arith.constant 0 : index
      %c0_26 = arith.constant 0 : index
      %48 = vector.load %arg2[%47, %c0_25, %c0_26] : memref<8x8x128xf32, #tpu.memory_space<vmem>>, vector<1x8x128xf32>
      %49 = vector.shape_cast %48 : vector<1x8x128xf32> to vector<8x128xf32>
      %c0_27 = arith.constant 0 : index
      %c0_28 = arith.constant 0 : index
      %50 = vector.load %arg8[%c0_27, %c0_28] : memref<8x256xf32, #tpu.memory_space<vmem>>, vector<8x128xf32>
      tpu.vector_store %arg8[%c0_27, %c0_28], %49 {strides = array<i32>} : memref<8x256xf32, #tpu.memory_space<vmem>>, vector<8x128xf32>,
      %c0_29 = arith.constant 0 : index
      %c0_30 = arith.constant 0 : index
      %51 = vector.load %arg8[%c0_29, %c0_30] : memref<8x256xf32, #tpu.memory_space<vmem>>, vector<8x256xf32>
      %c0_31 = arith.constant 0 : index
      %c0_32 = arith.constant 0 : index
      %52 = vector.load %arg4[%c0_31, %c0_32] : memref<256x256xf32, #tpu.memory_space<vmem>>, vector<256x256xf32>
      %cst_33 = arith.constant dense<0.000000e+00> : vector<8x256xf32>
      %53 = tpu.matmul %51, %52, %cst_33 {dimension_numbers = #tpu.dot_dimension_numbers<[1], [0], [0], [1], [0, 0, 1, 1], [], []>} : vector<8x256xf32>, vector<256x256xf32>, vector<8x256xf32> -> vector<8x256xf32>
      %54 = arith.addf %53, %5 : vector<8x256xf32>
      %55 = vector.extract_strided_slice %54 {offsets = [0, 0], sizes = [8, 128], strides = [1, 1]} : vector<8x256xf32> to vector<8x128xf32>
      %c0_34 = arith.constant 0 : index
      %c128_35 = arith.constant 128 : index
      %56 = vector.load %arg8[%c0_34, %c128_35] : memref<8x256xf32, #tpu.memory_space<vmem>>, vector<8x128xf32>
      tpu.vector_store %arg8[%c0_34, %c128_35], %55 {strides = array<i32>} : memref<8x256xf32, #tpu.memory_space<vmem>>, vector<8x128xf32>,
      %57 = vector.extract_strided_slice %54 {offsets = [0, 128], sizes = [8, 128], strides = [1, 1]} : vector<8x256xf32> to vector<8x128xf32>
      %58 = arith.addf %57, %11 : vector<8x128xf32>
      %cst_36 = arith.constant dense<0xFF800000> : vector<8xf32>
      %59 = vector.multi_reduction <maximumf>, %58, %cst_36 [1] : vector<8x128xf32> to vector<8xf32>
      %60 = vector.shape_cast %59 : vector<8xf32> to vector<8x1xf32>
      %61 = vector.broadcast %60 : vector<8x1xf32> to vector<8x128xf32>
      %62 = arith.subf %58, %61 : vector<8x128xf32>
      %63 = math.exp %62 : vector<8x128xf32>
      %cst_37 = arith.constant dense<0.000000e+00> : vector<8xf32>
      %64 = vector.multi_reduction <add>, %63, %cst_37 [1] : vector<8x128xf32> to vector<8xf32>
      %65 = vector.shape_cast %64 : vector<8xf32> to vector<8x1xf32>
      %66 = math.log %65 : vector<8x1xf32>
      %67 = vector.broadcast %66 : vector<8x1xf32> to vector<8x128xf32>
      %68 = arith.subf %62, %67 : vector<8x128xf32>
      %69 = arith.index_cast %c7_i32 : i32 to index
      %c0_38 = arith.constant 0 : index
      %c0_39 = arith.constant 0 : index
      %70 = vector.load %arg6[%69, %c0_38, %c0_39] : memref<8x8x128xf32, #tpu.memory_space<vmem>>, vector<1x8x128xf32>
      %71 = vector.shape_cast %70 : vector<1x8x128xf32> to vector<8x128xf32>
      %72 = vector.shape_cast %68 : vector<8x128xf32> to vector<1x8x128xf32>
      tpu.vector_store %arg6[%69, %c0_38, %c0_39], %72 {strides = array<i32>} : memref<8x8x128xf32, #tpu.memory_space<vmem>>, vector<1x8x128xf32>,
    } else {
    }
    %c8_i32_21 = arith.constant 8 : i32
    %c0_22 = arith.constant 0 : index
    %c128 = arith.constant 128 : index
    %45 = vector.load %arg8[%c0_22, %c128] : memref<8x256xf32, #tpu.memory_space<vmem>>, vector<8x128xf32>
    %c0_23 = arith.constant 0 : index
    %c0_24 = arith.constant 0 : index
    %46 = vector.load %arg7[%c0_23, %c0_24] : memref<8x128xf32, #tpu.memory_space<vmem>>, vector<8x128xf32>
    tpu.vector_store %arg7[%c0_23, %c0_24], %45 {strides = array<i32>} : memref<8x128xf32, #tpu.memory_space<vmem>>, vector<8x128xf32>,
    return
  }
  func.func @transform_0(%arg0: i32, %arg1: i32) -> (i32, i32, i32) {
    %c0_i32 = arith.constant 0 : i32
    %c0_i32_0 = arith.constant 0 : i32
    return %arg1, %arg0, %c0_i32 : i32, i32, i32
  }
  func.func @transform_1(%arg0: i32, %arg1: i32) -> (i32, i32) {
    %c0_i32 = arith.constant 0 : i32
    %c0_i32_0 = arith.constant 0 : i32
    return %arg0, %c0_i32 : i32, i32
  }
  func.func @transform_2(%arg0: i32, %arg1: i32) -> (i32, i32) {
    %c0_i32 = arith.constant 0 : i32
    %c0_i32_0 = arith.constant 0 : i32
    %c0_i32_1 = arith.constant 0 : i32
    return %c0_i32, %c0_i32_0 : i32, i32
  }
  func.func @transform_3(%arg0: i32, %arg1: i32) -> (i32, i32) {
    %c0_i32 = arith.constant 0 : i32
    %c0_i32_0 = arith.constant 0 : i32
    %c0_i32_1 = arith.constant 0 : i32
    return %c0_i32, %c0_i32_0 : i32, i32
  }
  func.func @transform_4(%arg0: i32, %arg1: i32) -> (i32, i32, i32) {
    %c0_i32 = arith.constant 0 : i32
    %c0_i32_0 = arith.constant 0 : i32
    return %arg1, %arg0, %c0_i32 : i32, i32, i32
  }
  func.func @transform_5(%arg0: i32, %arg1: i32) -> (i32, i32) {
    %c0_i32 = arith.constant 0 : i32
    %c0_i32_0 = arith.constant 0 : i32
    return %arg0, %c0_i32 : i32, i32
  }
}

</mosaic_0001>

<bundles_post_ra>
// kernel: rnn_forward_sequence.1
= control target key start
LH: loop header
LB: loop body
LE: loop exit
PB: predicated region body
PF: predicated region fallthrough
CT: control target
= control target key end

     0   :  { %11 = vsyncpa [#allocation4], 0  ;;  %s1922_s18 = smov [#allocation3]   ;;  %s2455_s0 = inlined_call_operand.vmem [shape: f32[8,8,128], index: 0, kind: input, shape index: {}]   ;;  %s2456_s1 = inlined_call_operand.vmem [shape: f32[8,128], index: 1, kind: input, shape index: {}]   ;;  %s2457_s2 = inlined_call_operand.hbm [shape: f32[256,256], index: 2, kind: input, shape index: {}]   ;;  %s2458_s3 = inlined_call_operand.vmem [shape: f32[1,256], index: 3, kind: input, shape index: {}]   ;;  %s2459_s4 = inlined_call_operand.vmem [shape: f32[8,8,128], index: 4, kind: output, shape index: {0}]   ;;  %s2460_s5 = inlined_call_operand.vmem [shape: f32[8,128], index: 5, kind: output, shape index: {1}]  }
   0x1   :  { %s21_s19 = sshll.u32 %s1922_s18, 4  ;;  %s1898_s22 = scalar_lea.hbm %s2457_s2, 8192  ;;  %s22_s19 = int_to_ptr.vmem [resolvable:$true] %s21_s19 }
   0x2   :  { %p1899_p0 = scmp.ne.s32.totalorder %s2457_s2, %s1898_s22  ;;  %p1902_p1 = scmp.lt.u32.totalorder %s1898_s22, %s2457_s2 }
   0x4   :  { %p1904_p2 = pnand %p1902_p1, %p1899_p0 }
   0x6   :  { %1907 = shalt.err (!%p1904_p2)
}
   0x7   :  { %s1908_s27 = scalar_lea.vmem %s22_s19, 8192  ;;  %p1913_p4 = scmp.lt.s32.totalorder %s22_s19, %s22_s19 }
   0x8   :  { %p1909_p3 = scmp.ne.s32.totalorder %s22_s19, %s1908_s27  ;;  %p1914_p5 = scmp.lt.s32.totalorder %s1908_s27, %s1908_s27 }
   0xa   :  { %p1915_p6 = por %p1914_p5, %p1913_p4 }
   0xc   :  { %p1916_p7 = pnand %p1915_p6, %p1909_p3 }
   0xe   :  { %1919 = shalt.err (!%p1916_p7)
}
   0xf   :  { %s1923_s28 = smov 256   ;;  %s1924_s29 = smov 16  }
  0x10   :  { %27 = dma.hbm_to_vmem [thread:$0]  %s2457_s2, 8192, %s22_s19, [#allocation4], %s1923_s28, %s1923_s28, %s1924_s29  }
  0x11   :  { %1920 = dma.done.wait [#allocation4], 8192  }
  0x12   :  { %1921 = vsyncadd [#allocation4], 4294959104  ;;  %v65_v0 = vld [vmem:[#allocation3 + $0x8] sm:$0xff]  ;;  %v67_v1 = vld [vmem:[#allocation3 + $0x18] sm:$0xff] }
  0x13   :  { %v64_v2 = vld [vmem:[#allocation3] sm:$0xff]  ;;  %v1968_v3 = vpack.c.bf16 %v67_v1, %v65_v0  ;;  %v66_v4 = vld [vmem:[#allocation3 + $0x10] sm:$0xff]  ;;  %v69_v5 = vld [vmem:[#allocation3 + $0x28] sm:$0xff] }
  0x14   :  { %v71_v6 = vld [vmem:[#allocation3 + $0x38] sm:$0xff]  ;;  %v1970_v7 = vpack.c.bf16 %v66_v4, %v64_v2  ;;  %v68_v9 = vld [vmem:[#allocation3 + $0x20] sm:$0xff]  ;;  %v70_v10 = vld [vmem:[#allocation3 + $0x30] sm:$0xff] }
  0x15   :  { %v1972_v8 = vpack.c.bf16 %v71_v6, %v69_v5  ;;  %v73_v11 = vld [vmem:[#allocation3 + $0x48] sm:$0xff]  ;;  %1351 = vmatprep.subr.bf16.mxu0 %v1968_v3  ;;  %v75_v12 = vld [vmem:[#allocation3 + $0x58] sm:$0xff]  ;;  %1415 = vmatprep.subr.bf16.mxu1 %v1968_v3  ;;  %v1977_v13 = vpack.c.bf16 %v70_v10, %v68_v9  ;;  %v72_v15 = vld [vmem:[#allocation3 + $0x40] sm:$0xff] }
  0x16   :  { %1353 = vmatpush1.bf16.msra.mxu0 %v1970_v7  ;;  %1417 = vmatpush1.bf16.msra.mxu1 %v1970_v7  ;;  %v1981_v14 = vpack.c.bf16 %v75_v12, %v73_v11  ;;  %v74_v16 = vld [vmem:[#allocation3 + $0x50] sm:$0xff]  ;;  %v77_v17 = vld [vmem:[#allocation3 + $0x68] sm:$0xff]  ;;  %v79_v18 = vld [vmem:[#allocation3 + $0x78] sm:$0xff] }
  0x17   :  { %1355 = vmatprep.subr.bf16.mxu0 %v1972_v8  ;;  %1419 = vmatprep.subr.bf16.mxu1 %v1972_v8  ;;  %v1985_v19 = vpack.c.bf16 %v74_v16, %v72_v15  ;;  %v1989_v20 = vpack.c.bf16 %v79_v18, %v77_v17  ;;  %v76_v21 = vld [vmem:[#allocation3 + $0x60] sm:$0xff]  ;;  %v78_v22 = vld [vmem:[#allocation3 + $0x70] sm:$0xff]  ;;  %v81_v23 = vld [vmem:[#allocation3 + $0x88] sm:$0xff] }
  0x18   :  { %v83_v24 = vld [vmem:[#allocation3 + $0x98] sm:$0xff]  ;;  %v1993_v25 = vpack.c.bf16 %v78_v22, %v76_v21  ;;  %v80_v27 = vld [vmem:[#allocation3 + $0x80] sm:$0xff]  ;;  %v82_v28 = vld [vmem:[#allocation3 + $0x90] sm:$0xff] }
  0x19   :  { %v1997_v26 = vpack.c.bf16 %v83_v24, %v81_v23  ;;  %v85_v29 = vld [vmem:[#allocation3 + $0xa8] sm:$0xff]  ;;  %v87_v30 = vld [vmem:[#allocation3 + $0xb8] sm:$0xff]  ;;  %v2001_v31 = vpack.c.bf16 %v82_v28, %v80_v27  ;;  %v84_v33 = vld [vmem:[#allocation3 + $0xa0] sm:$0xff] }
  0x1a   :  { %1357 = vmatpush1.bf16.msra.mxu0 %v1977_v13  ;;  %1421 = vmatpush1.bf16.msra.mxu1 %v1977_v13  ;;  %v2005_v32 = vpack.c.bf16 %v87_v30, %v85_v29  ;;  %v86_v34 = vld [vmem:[#allocation3 + $0xb0] sm:$0xff]  ;;  %v89_v35 = vld [vmem:[#allocation3 + $0xc8] sm:$0xff]  ;;  %v91_v36 = vld [vmem:[#allocation3 + $0xd8] sm:$0xff] }
  0x1b   :  { %1359 = vmatprep.subr.bf16.mxu0 %v1981_v14  ;;  %1423 = vmatprep.subr.bf16.mxu1 %v1981_v14  ;;  %v2009_v37 = vpack.c.bf16 %v86_v34, %v84_v33  ;;  %v2013_v38 = vpack.c.bf16 %v91_v36, %v89_v35  ;;  %v88_v39 = vld [vmem:[#allocation3 + $0xc0] sm:$0xff]  ;;  %v90_v40 = vld [vmem:[#allocation3 + $0xd0] sm:$0xff]  ;;  %v93_v42 = vld [vmem:[#allocation3 + $0xe8] sm:$0xff] }
  0x1c   :  { %v37_v41 = vld [vmem:[%s2456_s1] sm:$0xff]  ;;  %v95_v43 = vld [vmem:[#allocation3 + $0xf8] sm:$0xff]  ;;  %v2020_v44 = vpack.c.bf16 %v90_v40, %v88_v39  ;;  %v94_v47 = vld [vmem:[#allocation3 + $0xf0] sm:$0xff] }
  0x1d   :  { %192 = vmatprep.mubr.f32.mxu0 %v37_v41  ;;  %v2024_v45 = vpack.c.bf16 %v95_v43, %v93_v42  ;;  %v92_v46 = vld [vmem:[#allocation3 + $0xe0] sm:$0xff]  ;;  %v97_v48 = vld [vmem:[#allocation3 + $0x108] sm:$0xff]  ;;  %v99_v49 = vld [vmem:[#allocation3 + $0x118] sm:$0xff] }
  0x1e   :  { %1361 = vmatpush1.bf16.msra.mxu0 %v1985_v19  ;;  %1425 = vmatpush1.bf16.msra.mxu1 %v1985_v19  ;;  %v2028_v50 = vpack.c.bf16 %v94_v47, %v92_v46  ;;  %v2032_v51 = vpack.c.bf16 %v99_v49, %v97_v48  ;;  %v96_v52 = vld [vmem:[#allocation3 + $0x100] sm:$0xff]  ;;  %v98_v53 = vld [vmem:[#allocation3 + $0x110] sm:$0xff]  ;;  %v101_v54 = vld [vmem:[#allocation3 + $0x128] sm:$0xff] }
  0x1f   :  { %1363 = vmatprep.subr.bf16.mxu0 %v1989_v20  ;;  %1427 = vmatprep.subr.bf16.mxu1 %v1989_v20  ;;  %v103_v55 = vld [vmem:[#allocation3 + $0x138] sm:$0xff]  ;;  %v2036_v56 = vpack.c.bf16 %v98_v53, %v96_v52  ;;  %v100_v58 = vld [vmem:[#allocation3 + $0x120] sm:$0xff]  ;;  %v102_v59 = vld [vmem:[#allocation3 + $0x130] sm:$0xff] }
  0x20   :  { %v2040_v57 = vpack.c.bf16 %v103_v55, %v101_v54  ;;  %v105_v60 = vld [vmem:[#allocation3 + $0x148] sm:$0xff]  ;;  %v107_v61 = vld [vmem:[#allocation3 + $0x158] sm:$0xff]  ;;  %v2044_v62 = vpack.c.bf16 %v102_v59, %v100_v58  ;;  %v104_v0 = vld [vmem:[#allocation3 + $0x140] sm:$0xff] }
  0x21   :  { %v2048_v63 = vpack.c.bf16 %v107_v61, %v105_v60  ;;  %v106_v1 = vld [vmem:[#allocation3 + $0x150] sm:$0xff]  ;;  %v109_v2 = vld [vmem:[#allocation3 + $0x168] sm:$0xff]  ;;  %v111_v4 = vld [vmem:[#allocation3 + $0x178] sm:$0xff] }
  0x22   :  { %1365 = vmatpush1.bf16.msra.mxu0 %v1993_v25  ;;  %1429 = vmatpush1.bf16.msra.mxu1 %v1993_v25  ;;  %v2052_v5 = vpack.c.bf16 %v106_v1, %v104_v0  ;;  %v2056_v6 = vpack.c.bf16 %v111_v4, %v109_v2  ;;  %v108_v9 = vld [vmem:[#allocation3 + $0x160] sm:$0xff]  ;;  %v110_v10 = vld [vmem:[#allocation3 + $0x170] sm:$0xff]  ;;  %v113_v11 = vld [vmem:[#allocation3 + $0x188] sm:$0xff]  ;;  %v1925_v2 = vmov -1e+30  }
  0x23   :  { %1367 = vmatprep.subr.bf16.mxu0 %v1997_v26  ;;  %1431 = vmatprep.subr.bf16.mxu1 %v1997_v26  ;;  %v115_v12 = vld [vmem:[#allocation3 + $0x198] sm:$0xff]  ;;  %v2060_v15 = vpack.c.bf16 %v110_v10, %v108_v9  ;;  %v112_v17 = vld [vmem:[#allocation3 + $0x180] sm:$0xff]  ;;  %v114_v18 = vld [vmem:[#allocation3 + $0x190] sm:$0xff] }
  0x24   :  { %v2064_v16 = vpack.c.bf16 %v115_v12, %v113_v11  ;;  %v117_v21 = vld [vmem:[#allocation3 + $0x1a8] sm:$0xff]  ;;  %v119_v22 = vld [vmem:[#allocation3 + $0x1b8] sm:$0xff]  ;;  %v2068_v23 = vpack.c.bf16 %v114_v18, %v112_v17  ;;  %v116_v27 = vld [vmem:[#allocation3 + $0x1a0] sm:$0xff] }
  0x25   :  { %v2072_v24 = vpack.c.bf16 %v119_v22, %v117_v21  ;;  %v118_v28 = vld [vmem:[#allocation3 + $0x1b0] sm:$0xff]  ;;  %v121_v29 = vld [vmem:[#allocation3 + $0x1c8] sm:$0xff]  ;;  %v123_v30 = vld [vmem:[#allocation3 + $0x1d8] sm:$0xff] }
  0x26   :  { %1369 = vmatpush1.bf16.msra.mxu0 %v2001_v31  ;;  %1433 = vmatpush1.bf16.msra.mxu1 %v2001_v31  ;;  %v2076_v33 = vpack.c.bf16 %v118_v28, %v116_v27  ;;  %v2080_v34 = vpack.c.bf16 %v123_v30, %v121_v29  ;;  %v120_v35 = vld [vmem:[#allocation3 + $0x1c0] sm:$0xff]  ;;  %v122_v36 = vld [vmem:[#allocation3 + $0x1d0] sm:$0xff]  ;;  %v125_v39 = vld [vmem:[#allocation3 + $0x1e8] sm:$0xff] }
  0x27   :  { %1371 = vmatprep.subr.bf16.mxu0 %v2005_v32  ;;  %1435 = vmatprep.subr.bf16.mxu1 %v2005_v32  ;;  %v127_v40 = vld [vmem:[#allocation3 + $0x1f8] sm:$0xff]  ;;  %v2084_v41 = vpack.c.bf16 %v122_v36, %v120_v35  ;;  %v124_v43 = vld [vmem:[#allocation3 + $0x1e0] sm:$0xff]  ;;  %v126_v46 = vld [vmem:[#allocation3 + $0x1f0] sm:$0xff] }
  0x28   :  { %v2088_v42 = vpack.c.bf16 %v127_v40, %v125_v39  ;;  %v2092_v47 = vpack.c.bf16 %v126_v46, %v124_v43  ;;  %v60_v48 = vld [vmem:[%s2455_s0] sm:$0xff]  ;;  %v1336_v1 = vld [vmem:[%s2455_s0 + $0x8] sm:$0xff]  ;;  %v705_v11 = vld [vmem:[#allocation3 + $0x30] sm:$0xff] }
  0x29   :  { %v39_v53 = vld [vmem:[%s2458_s3] sm:$0x3]  ;;  %v708_v12 = vld [vmem:[#allocation3 + $0x48] sm:$0xff]  ;;  %v709_v21 = vld [vmem:[#allocation3 + $0x50] sm:$0xff] }
  0x2a   :  { %1373 = vmatpush1.bf16.msra.mxu0 %v2009_v37  ;;  %1437 = vmatpush1.bf16.msra.mxu1 %v2009_v37  ;;  %v707_v18 = vld [vmem:[#allocation3 + $0x40] sm:$0xff]  ;;  %v712_v22 = vld [vmem:[#allocation3 + $0x68] sm:$0xff]  ;;  %v713_v29 = vld [vmem:[#allocation3 + $0x70] sm:$0xff] }
  0x2b   :  { %1375 = vmatprep.subr.bf16.mxu0 %v2013_v38  ;;  %1439 = vmatprep.subr.bf16.mxu1 %v2013_v38  ;;  %v711_v28 = vld [vmem:[#allocation3 + $0x60] sm:$0xff]  ;;  %v716_v30 = vld [vmem:[#allocation3 + $0x88] sm:$0xff]  ;;  %v717_v39 = vld [vmem:[#allocation3 + $0x90] sm:$0xff] }
  0x2c   :  { %v715_v36 = vld [vmem:[#allocation3 + $0x80] sm:$0xff]  ;;  %v720_v40 = vld [vmem:[#allocation3 + $0xa8] sm:$0xff] }
  0x2d   :  { %v719_v46 = vld [vmem:[#allocation3 + $0xa0] sm:$0xff] }
  0x2e   :  { %1377 = vmatpush1.bf16.msra.mxu0 %v2020_v44  ;;  %1441 = vmatpush1.bf16.msra.mxu1 %v2020_v44 }
  0x2f   :  { %1379 = vmatprep.subr.bf16.mxu0 %v2024_v45  ;;  %1443 = vmatprep.subr.bf16.mxu1 %v2024_v45 }
  0x32   :  { %1381 = vmatpush1.bf16.msra.mxu0 %v2028_v50  ;;  %1445 = vmatpush1.bf16.msra.mxu1 %v2028_v50 }
  0x33   :  { %1383 = vmatprep.subr.bf16.mxu0 %v2032_v51  ;;  %1447 = vmatprep.subr.bf16.mxu1 %v2032_v51 }
  0x36   :  { %1385 = vmatpush1.bf16.msra.mxu0 %v2036_v56  ;;  %1449 = vmatpush1.bf16.msra.mxu1 %v2036_v56 }
  0x37   :  { %1387 = vmatprep.subr.bf16.mxu0 %v2040_v57  ;;  %1451 = vmatprep.subr.bf16.mxu1 %v2040_v57 }
  0x3a   :  { %1389 = vmatpush1.bf16.msra.mxu0 %v2044_v62  ;;  %1453 = vmatpush1.bf16.msra.mxu1 %v2044_v62 }
  0x3b   :  { %1391 = vmatprep.subr.bf16.mxu0 %v2048_v63  ;;  %1455 = vmatprep.subr.bf16.mxu1 %v2048_v63 }
  0x3e   :  { %1393 = vmatpush1.bf16.msra.mxu0 %v2052_v5  ;;  %1457 = vmatpush1.bf16.msra.mxu1 %v2052_v5 }
  0x3f   :  { %1395 = vmatprep.subr.bf16.mxu0 %v2056_v6  ;;  %1459 = vmatprep.subr.bf16.mxu1 %v2056_v6 }
  0x42   :  { %1397 = vmatpush1.bf16.msra.mxu0 %v2060_v15  ;;  %1461 = vmatpush1.bf16.msra.mxu1 %v2060_v15 }
  0x43   :  { %1399 = vmatprep.subr.bf16.mxu0 %v2064_v16  ;;  %1463 = vmatprep.subr.bf16.mxu1 %v2064_v16 }
  0x46   :  { %1401 = vmatpush1.bf16.msra.mxu0 %v2068_v23  ;;  %1465 = vmatpush1.bf16.msra.mxu1 %v2068_v23 }
  0x47   :  { %1403 = vmatprep.subr.bf16.mxu0 %v2072_v24  ;;  %1467 = vmatprep.subr.bf16.mxu1 %v2072_v24 }
  0x4a   :  { %1405 = vmatpush1.bf16.msra.mxu0 %v2076_v33  ;;  %1469 = vmatpush1.bf16.msra.mxu1 %v2076_v33 }
  0x4b   :  { %1407 = vmatprep.subr.bf16.mxu0 %v2080_v34  ;;  %1471 = vmatprep.subr.bf16.mxu1 %v2080_v34 }
  0x4e   :  { %1409 = vmatpush1.bf16.msra.mxu0 %v2084_v41  ;;  %1473 = vmatpush1.bf16.msra.mxu1 %v2084_v41 }
  0x4f   :  { %1411 = vmatprep.subr.bf16.mxu0 %v2088_v42  ;;  %1475 = vmatprep.subr.bf16.mxu1 %v2088_v42 }
  0x52   :  { %1413 = vmatpush1.bf16.msra.mxu0 %v2092_v47  ;;  %1477 = vmatpush1.bf16.msra.mxu1 %v2092_v47 }
  0x53   :  { %1479 = vmatprep.subr.bf16.mxu0 %v1968_v3  ;;  %1543 = vmatprep.subr.bf16.mxu1 %v1968_v3  ;;  %v41_v3 = vlaneseq }
  0x55   :  { %193 = vmatmul.mubr.f32.vlgmr.msra.gmra.mrb[0].mxu0 %v60_v48  ;;  %v42_v49 = vshrl.u32 %v41_v3, 7  ;;  %v52_v55 = vand.u32 127, %v41_v3  ;;  %v724_v48 = vld [vmem:[#allocation3 + $0xc8] sm:$0xff]  ;;  %v726_v3 = vld [vmem:[#allocation3 + $0xd8] sm:$0xff] }
  0x56   :  { %1481 = vmatpush1.bf16.msra.mxu0 %v1970_v7 }
  0x57   :  { %1483 = vmatprep.subr.bf16.mxu0 %v1972_v8  ;;  %v43_v52 = vsub.s32 0, %v42_v49  ;;  %v47_v54 = vsub.s32 1, %v42_v49  ;;  %vm53_vm0 = vcmp.lt.s32.totalorder %v52_v55, 4  ;;  %v728_v55 = vld [vmem:[#allocation3 + $0xe8] sm:$0xff] }
  0x58   :  { %v2146_v4 = vsel %vm53_vm0, 0.0, %v1925_v2  ;;  %v729_v2 = vld [vmem:[#allocation3 + $0xf0] sm:$0xff] }
  0x59   :  { %v2138_v58 = vrot.slane %v39_v53, %v43_v52  ;;  %v2140_v59 = vrot.slane %v39_v53, %v47_v54  ;;  %v2247_v52 = vpack.c.bf16 %v726_v3, %v724_v48  ;;  %v723_v53 = vld [vmem:[#allocation3 + $0xc0] sm:$0xff]  ;;  %v725_v54 = vld [vmem:[#allocation3 + $0xd0] sm:$0xff]  ;;  %v756_v3 = vld [vmem:[#allocation3 + $0x1c8] sm:$0xff] }
  0x5a   :  { %1485 = vmatpush1.bf16.msra.mxu0 %v1977_v13  ;;  %v753_v48 = vld [vmem:[#allocation3 + $0x1b0] sm:$0xff] }
  0x5b   :  { %1487 = vmatprep.subr.bf16.mxu0 %v1981_v14 }
  0x5e   :  { %1489 = vmatpush1.bf16.msra.mxu0 %v1985_v19 }
  0x5f   :  { %1491 = vmatprep.subr.bf16.mxu0 %v1989_v20 }
  0x62   :  { %1493 = vmatpush1.bf16.msra.mxu0 %v1993_v25 }
  0x63   :  { %1495 = vmatprep.subr.bf16.mxu0 %v1997_v26 }
  0x66   :  { %1497 = vmatpush1.bf16.msra.mxu0 %v2001_v31 }
  0x67   :  { %1499 = vmatprep.subr.bf16.mxu0 %v2005_v32 }
  0x6a   :  { %1501 = vmatpush1.bf16.msra.mxu0 %v2009_v37 }
  0x6b   :  { %1503 = vmatprep.subr.bf16.mxu0 %v2013_v38 }
  0x6e   :  { %1505 = vmatpush1.bf16.msra.mxu0 %v2020_v44 }
  0x6f   :  { %1507 = vmatprep.subr.bf16.mxu0 %v2024_v45 }
  0x72   :  { %1509 = vmatpush1.bf16.msra.mxu0 %v2028_v50 }
  0x73   :  { %1511 = vmatprep.subr.bf16.mxu0 %v2032_v51 }
  0x76   :  { %1513 = vmatpush1.bf16.msra.mxu0 %v2036_v56 }
  0x77   :  { %1515 = vmatprep.subr.bf16.mxu0 %v2040_v57 }
  0x7a   :  { %1517 = vmatpush1.bf16.msra.mxu0 %v2044_v62 }
  0x7b   :  { %1519 = vmatprep.subr.bf16.mxu0 %v2048_v63 }
  0x7e   :  { %1521 = vmatpush1.bf16.msra.mxu0 %v2052_v5 }
  0x7f   :  { %1523 = vmatprep.subr.bf16.mxu0 %v2056_v6 }
  0x82   :  { %1525 = vmatpush1.bf16.msra.mxu0 %v2060_v15 }
  0x83   :  { %1527 = vmatprep.subr.bf16.mxu0 %v2064_v16 }
  0x86   :  { %1529 = vmatpush1.bf16.msra.mxu0 %v2068_v23 }
  0x87   :  { %1531 = vmatprep.subr.bf16.mxu0 %v2072_v24 }
  0x8a   :  { %1533 = vmatpush1.bf16.msra.mxu0 %v2076_v33 }
  0x8b   :  { %1535 = vmatprep.subr.bf16.mxu0 %v2080_v34 }
  0x8e   :  { %1537 = vmatpush1.bf16.msra.mxu0 %v2084_v41 }
  0x8f   :  { %1539 = vmatprep.subr.bf16.mxu0 %v2088_v42 }
  0x92   :  { %1541 = vmatpush1.bf16.msra.mxu0 %v2092_v47 }
 0x128   :  { %v194_v60 = vpop.f32.mrb[0].mxu0 }
 0x129   :  { %v196_v61 = vpop.f32.mrb[1].mxu0  ;;  %v195_v0 = vadd.f32 %v194_v60, %v2138_v58  ;;  %v730_v60 = vld [vmem:[#allocation3 + $0xf8] sm:$0xff] }
 0x12a   :  { %v197_v9 = vadd.f32 %v196_v61, %v2140_v59  ;;  %v2251_v61 = vpack.c.bf16 %v725_v54, %v723_v53  ;;  %v758_v53 = vld [vmem:[#allocation3 + $0x1d8] sm:$0xff] }
 0x12b   :  { %350 = vmatprep.mubr.f32.mxu1 %v195_v0  ;;  %v2255_v0 = vpack.c.bf16 %v730_v60, %v728_v55  ;;  %v2311_v55 = vpack.c.bf16 %v758_v53, %v756_v3  ;;  %v755_v60 = vld [vmem:[#allocation3 + $0x1c0] sm:$0xff] }
 0x12c   :  { %351 = vmatmul.mubr.f32.vlgmr.msra.gmra.mrb[0].mxu1 %v1336_v1  ;;  %v2150_v10 = vadd.f32 %v197_v9, %v2146_v4  ;;  %v727_v1 = vld [vmem:[#allocation3 + $0xe0] sm:$0xff]  ;;  %v732_v9 = vld [vmem:[#allocation3 + $0x108] sm:$0xff] }
 0x12d   :  { %1545 = vmatpush1.bf16.msra.mxu1 %v1970_v7 }
 0x12e   :  { %201 = vmax.xlane.f32.xlu0 %v2150_v10  ;;  %1547 = vmatprep.subr.bf16.mxu1 %v1972_v8 }
 0x131   :  { %1549 = vmatpush1.bf16.msra.mxu1 %v1977_v13 }
 0x132   :  { %1551 = vmatprep.subr.bf16.mxu1 %v1981_v14  ;;  %v1338_v14 = vld [vmem:[%s2455_s0 + $0x10] sm:$0xff] }
 0x135   :  { %1553 = vmatpush1.bf16.msra.mxu1 %v1985_v19 }
 0x136   :  { %1555 = vmatprep.subr.bf16.mxu1 %v1989_v20 }
 0x139   :  { %1557 = vmatpush1.bf16.msra.mxu1 %v1993_v25 }
 0x13a   :  { %1559 = vmatprep.subr.bf16.mxu1 %v1997_v26 }
 0x13d   :  { %1561 = vmatpush1.bf16.msra.mxu1 %v2001_v31 }
 0x13e   :  { %1563 = vmatprep.subr.bf16.mxu1 %v2005_v32  ;;  %v1340_v32 = vld [vmem:[%s2455_s0 + $0x18] sm:$0xff] }
 0x141   :  { %1565 = vmatpush1.bf16.msra.mxu1 %v2009_v37 }
 0x142   :  { %1567 = vmatprep.subr.bf16.mxu1 %v2013_v38 }
 0x145   :  { %1569 = vmatpush1.bf16.msra.mxu1 %v2020_v44  ;;  %v700_v44 = vld [vmem:[#allocation3 + $0x8] sm:$0xff] }
 0x146   :  { %1571 = vmatprep.subr.bf16.mxu1 %v2024_v45  ;;  %v702_v45 = vld [vmem:[#allocation3 + $0x18] sm:$0xff] }
 0x149   :  { %1573 = vmatpush1.bf16.msra.mxu1 %v2028_v50  ;;  %v699_v50 = vld [vmem:[#allocation3] sm:$0xff] }
 0x14a   :  { %1575 = vmatprep.subr.bf16.mxu1 %v2032_v51  ;;  %v2202_v51 = vpack.c.bf16 %v702_v45, %v700_v44  ;;  %v737_v44 = vld [vmem:[#allocation3 + $0x130] sm:$0xff]  ;;  %v740_v45 = vld [vmem:[#allocation3 + $0x148] sm:$0xff] }
 0x14c   :  { %1607 = vmatprep.subr.bf16.mxu0 %v2202_v51 }
 0x14d   :  { %1577 = vmatpush1.bf16.msra.mxu1 %v2036_v56  ;;  %v701_v56 = vld [vmem:[#allocation3 + $0x10] sm:$0xff] }
 0x14e   :  { %1579 = vmatprep.subr.bf16.mxu1 %v2040_v57  ;;  %v704_v57 = vld [vmem:[#allocation3 + $0x28] sm:$0xff] }
 0x151   :  { %1581 = vmatpush1.bf16.msra.mxu1 %v2044_v62  ;;  %v706_v62 = vld [vmem:[#allocation3 + $0x38] sm:$0xff] }
 0x152   :  { %1583 = vmatprep.subr.bf16.mxu1 %v2048_v63  ;;  %v2204_v63 = vpack.c.bf16 %v701_v56, %v699_v50  ;;  %v742_v50 = vld [vmem:[#allocation3 + $0x158] sm:$0xff] }
 0x155   :  { %1585 = vmatpush1.bf16.msra.mxu1 %v2052_v5  ;;  %v2206_v5 = vpack.c.bf16 %v706_v62, %v704_v57  ;;  %v2279_v57 = vpack.c.bf16 %v742_v50, %v740_v45  ;;  %v739_v62 = vld [vmem:[#allocation3 + $0x140] sm:$0xff] }
 0x156   :  { %1587 = vmatprep.subr.bf16.mxu1 %v2056_v6  ;;  %v703_v6 = vld [vmem:[#allocation3 + $0x20] sm:$0xff] }
 0x157   :  { %v1342_v50 = vld [vmem:[%s2455_s0 + $0x20] sm:$0xff] }
 0x159   :  { %1589 = vmatpush1.bf16.msra.mxu1 %v2060_v15  ;;  %v710_v15 = vld [vmem:[#allocation3 + $0x58] sm:$0xff] }
 0x15a   :  { %1591 = vmatprep.subr.bf16.mxu1 %v2064_v16  ;;  %v2211_v16 = vpack.c.bf16 %v705_v11, %v703_v6  ;;  %v2215_v17 = vpack.c.bf16 %v710_v15, %v708_v12  ;;  %v741_v6 = vld [vmem:[#allocation3 + $0x150] sm:$0xff]  ;;  %v744_v11 = vld [vmem:[#allocation3 + $0x168] sm:$0xff]  ;;  %v746_v12 = vld [vmem:[#allocation3 + $0x178] sm:$0xff] }
 0x15b   :  { %v2283_v15 = vpack.c.bf16 %v741_v6, %v739_v62 }
 0x15d   :  { %1593 = vmatpush1.bf16.msra.mxu1 %v2068_v23  ;;  %v714_v23 = vld [vmem:[#allocation3 + $0x78] sm:$0xff] }
 0x15e   :  { %1595 = vmatprep.subr.bf16.mxu1 %v2072_v24  ;;  %v2219_v24 = vpack.c.bf16 %v709_v21, %v707_v18  ;;  %v2223_v27 = vpack.c.bf16 %v714_v23, %v712_v22  ;;  %v2287_v18 = vpack.c.bf16 %v746_v12, %v744_v11  ;;  %v743_v21 = vld [vmem:[#allocation3 + $0x160] sm:$0xff]  ;;  %v745_v22 = vld [vmem:[#allocation3 + $0x170] sm:$0xff]  ;;  %v748_v23 = vld [vmem:[#allocation3 + $0x188] sm:$0xff] }
 0x161   :  { %1597 = vmatpush1.bf16.msra.mxu1 %v2076_v33  ;;  %v718_v33 = vld [vmem:[#allocation3 + $0x98] sm:$0xff] }
 0x162   :  { %1599 = vmatprep.subr.bf16.mxu1 %v2080_v34  ;;  %v2227_v34 = vpack.c.bf16 %v713_v29, %v711_v28  ;;  %v2231_v35 = vpack.c.bf16 %v718_v33, %v716_v30  ;;  %v750_v28 = vld [vmem:[#allocation3 + $0x198] sm:$0xff]  ;;  %v2291_v29 = vpack.c.bf16 %v745_v22, %v743_v21  ;;  %v747_v33 = vld [vmem:[#allocation3 + $0x180] sm:$0xff]  ;;  %v1344_v21 = vld [vmem:[%s2455_s0 + $0x28] sm:$0xff] }
 0x163   :  { %v2295_v30 = vpack.c.bf16 %v750_v28, %v748_v23 }
 0x165   :  { %1601 = vmatpush1.bf16.msra.mxu1 %v2084_v41  ;;  %v722_v41 = vld [vmem:[#allocation3 + $0xb8] sm:$0xff] }
 0x166   :  { %1603 = vmatprep.subr.bf16.mxu1 %v2088_v42  ;;  %v2235_v42 = vpack.c.bf16 %v717_v39, %v715_v36  ;;  %v2239_v43 = vpack.c.bf16 %v722_v41, %v720_v40  ;;  %v749_v36 = vld [vmem:[#allocation3 + $0x190] sm:$0xff]  ;;  %v752_v39 = vld [vmem:[#allocation3 + $0x1a8] sm:$0xff]  ;;  %v754_v40 = vld [vmem:[#allocation3 + $0x1b8] sm:$0xff] }
 0x167   :  { %v2299_v41 = vpack.c.bf16 %v749_v36, %v747_v33 }
 0x169   :  { %1605 = vmatpush1.bf16.msra.mxu1 %v2092_v47  ;;  %v721_v47 = vld [vmem:[#allocation3 + $0xb0] sm:$0xff] }
 0x16a   :  { %1671 = vmatprep.subr.bf16.mxu1 %v2202_v51  ;;  %v2243_v49 = vpack.c.bf16 %v721_v47, %v719_v46  ;;  %v2303_v46 = vpack.c.bf16 %v754_v40, %v752_v39  ;;  %v751_v47 = vld [vmem:[#allocation3 + $0x1a0] sm:$0xff] }
 0x16b   :  { %v2307_v54 = vpack.c.bf16 %v753_v48, %v751_v47 }
 0x1ff   :  { %v352_v7 = vpop.f32.mrb[0].mxu1 }
 0x200   :  { %v353_v8 = vadd.f32 %v352_v7, %v2138_v58  ;;  %v354_v13 = vpop.f32.mrb[1].mxu1  ;;  %v734_v7 = vld [vmem:[#allocation3 + $0x118] sm:$0xff] }
 0x201   :  { %v355_v19 = vadd.f32 %v354_v13, %v2140_v59  ;;  %v2263_v13 = vpack.c.bf16 %v734_v7, %v732_v9  ;;  %v760_v9 = vld [vmem:[#allocation3 + $0x1e8] sm:$0xff]  ;;  %v762_v7 = vld [vmem:[#allocation3 + $0x1f8] sm:$0xff] }
 0x202   :  { %509 = vmatprep.mubr.f32.mxu0 %v353_v8  ;;  %v2259_v8 = vpack.c.bf16 %v729_v2, %v727_v1  ;;  %v757_v1 = vld [vmem:[#allocation3 + $0x1d0] sm:$0xff] }
 0x203   :  { %510 = vmatmul.mubr.f32.vlgmr.msra.gmra.mrb[2].mxu0 %v1338_v14  ;;  %v2190_v20 = vadd.f32 %v355_v19, %v2146_v4  ;;  %v731_v14 = vld [vmem:[#allocation3 + $0x100] sm:$0xff]  ;;  %v733_v19 = vld [vmem:[#allocation3 + $0x110] sm:$0xff]  ;;  %v2315_v2 = vpack.c.bf16 %v757_v1, %v755_v60 }
 0x204   :  { %1609 = vmatpush1.bf16.msra.mxu0 %v2204_v63 }
 0x205   :  { %359 = vmax.xlane.f32.xlu0 %v2190_v20  ;;  %1611 = vmatprep.subr.bf16.mxu0 %v2206_v5 }
 0x208   :  { %1613 = vmatpush1.bf16.msra.mxu0 %v2211_v16 }
 0x209   :  { %1615 = vmatprep.subr.bf16.mxu0 %v2215_v17 }
 0x20c   :  { %1617 = vmatpush1.bf16.msra.mxu0 %v2219_v24 }
 0x20d   :  { %1619 = vmatprep.subr.bf16.mxu0 %v2223_v27 }
 0x210   :  { %1621 = vmatpush1.bf16.msra.mxu0 %v2227_v34 }
 0x211   :  { %1623 = vmatprep.subr.bf16.mxu0 %v2231_v35 }
 0x214   :  { %1625 = vmatpush1.bf16.msra.mxu0 %v2235_v42 }
 0x215   :  { %1627 = vmatprep.subr.bf16.mxu0 %v2239_v43 }
 0x218   :  { %1629 = vmatpush1.bf16.msra.mxu0 %v2243_v49 }
 0x219   :  { %1631 = vmatprep.subr.bf16.mxu0 %v2247_v52 }
 0x21c   :  { %1633 = vmatpush1.bf16.msra.mxu0 %v2251_v61 }
 0x21d   :  { %1635 = vmatprep.subr.bf16.mxu0 %v2255_v0 }
 0x220   :  { %1637 = vmatpush1.bf16.msra.mxu0 %v2259_v8 }
 0x221   :  { %1639 = vmatprep.subr.bf16.mxu0 %v2263_v13 }
 0x2d6   :  { %v511_v25 = vpop.f32.mrb[2].mxu0 }
 0x2d7   :  { %v512_v26 = vadd.f32 %v511_v25, %v2138_v58  ;;  %v513_v31 = vpop.f32.mrb[3].mxu0  ;;  %v736_v25 = vld [vmem:[#allocation3 + $0x128] sm:$0xff] }
 0x2d8   :  { %v514_v37 = vadd.f32 %v513_v31, %v2140_v59  ;;  %v2267_v31 = vpack.c.bf16 %v733_v19, %v731_v14  ;;  %v2322_v14 = vpack.c.bf16 %v762_v7, %v760_v9  ;;  %v759_v19 = vld [vmem:[#allocation3 + $0x1e0] sm:$0xff] }
 0x2d9   :  { %668 = vmatprep.mubr.f32.mxu1 %v512_v26  ;;  %v738_v26 = vld [vmem:[#allocation3 + $0x138] sm:$0xff] }
 0x2da   :  { %669 = vmatmul.mubr.f32.vlgmr.msra.gmra.mrb[2].mxu1 %v1340_v32  ;;  %v2199_v38 = vadd.f32 %v514_v37, %v2146_v4  ;;  %v2271_v32 = vpack.c.bf16 %v738_v26, %v736_v25  ;;  %v735_v37 = vld [vmem:[#allocation3 + $0x120] sm:$0xff]  ;;  %1641 = vmatpush1.bf16.msra.mxu0 %v2267_v31  ;;  %v761_v25 = vld [vmem:[#allocation3 + $0x1f0] sm:$0xff] }
 0x2db   :  { %1673 = vmatpush1.bf16.msra.mxu1 %v2204_v63  ;;  %v2275_v56 = vpack.c.bf16 %v737_v44, %v735_v37  ;;  %v2324_v26 = vpack.c.bf16 %v761_v25, %v759_v19 }
 0x2dc   :  { %518 = vmax.xlane.f32.xlu1 %v2199_v38  ;;  %1675 = vmatprep.subr.bf16.mxu1 %v2206_v5 }
 0x2dd   :  { %1643 = vmatprep.subr.bf16.mxu0 %v2271_v32 }
 0x2de   :  { %1645 = vmatpush1.bf16.msra.mxu0 %v2275_v56 }
 0x2df   :  { %1677 = vmatpush1.bf16.msra.mxu1 %v2211_v16  ;;  %1647 = vmatprep.subr.bf16.mxu0 %v2279_v57 }
 0x2e0   :  { %1679 = vmatprep.subr.bf16.mxu1 %v2215_v17 }
 0x2e2   :  { %1649 = vmatpush1.bf16.msra.mxu0 %v2283_v15 }
 0x2e3   :  { %1681 = vmatpush1.bf16.msra.mxu1 %v2219_v24  ;;  %1651 = vmatprep.subr.bf16.mxu0 %v2287_v18 }
 0x2e4   :  { %1683 = vmatprep.subr.bf16.mxu1 %v2223_v27 }
 0x2e6   :  { %1653 = vmatpush1.bf16.msra.mxu0 %v2291_v29 }
 0x2e7   :  { %1685 = vmatpush1.bf16.msra.mxu1 %v2227_v34  ;;  %1655 = vmatprep.subr.bf16.mxu0 %v2295_v30 }
 0x2e8   :  { %1687 = vmatprep.subr.bf16.mxu1 %v2231_v35 }
 0x2ea   :  { %1657 = vmatpush1.bf16.msra.mxu0 %v2299_v41 }
 0x2eb   :  { %1689 = vmatpush1.bf16.msra.mxu1 %v2235_v42  ;;  %1659 = vmatprep.subr.bf16.mxu0 %v2303_v46 }
 0x2ec   :  { %1691 = vmatprep.subr.bf16.mxu1 %v2239_v43 }
 0x2ee   :  { %1661 = vmatpush1.bf16.msra.mxu0 %v2307_v54 }
 0x2ef   :  { %1693 = vmatpush1.bf16.msra.mxu1 %v2243_v49  ;;  %1663 = vmatprep.subr.bf16.mxu0 %v2311_v55 }
 0x2f0   :  { %1695 = vmatprep.subr.bf16.mxu1 %v2247_v52 }
 0x2f2   :  { %1665 = vmatpush1.bf16.msra.mxu0 %v2315_v2 }
 0x2f3   :  { %1697 = vmatpush1.bf16.msra.mxu1 %v2251_v61  ;;  %1667 = vmatprep.subr.bf16.mxu0 %v2322_v14 }
 0x2f4   :  { %1699 = vmatprep.subr.bf16.mxu1 %v2255_v0 }
 0x2f6   :  { %1669 = vmatpush1.bf16.msra.mxu0 %v2324_v26 }
 0x2f7   :  { %1701 = vmatpush1.bf16.msra.mxu1 %v2259_v8  ;;  %1735 = vmatprep.subr.bf16.mxu0 %v2202_v51 }
 0x2f8   :  { %1703 = vmatprep.subr.bf16.mxu1 %v2263_v13 }
 0x2fb   :  { %1705 = vmatpush1.bf16.msra.mxu1 %v2267_v31 }
 0x2fc   :  { %1707 = vmatprep.subr.bf16.mxu1 %v2271_v32 }
 0x2ff   :  { %1709 = vmatpush1.bf16.msra.mxu1 %v2275_v56 }
 0x300   :  { %1711 = vmatprep.subr.bf16.mxu1 %v2279_v57 }
 0x303   :  { %1713 = vmatpush1.bf16.msra.mxu1 %v2283_v15 }
 0x304   :  { %1715 = vmatprep.subr.bf16.mxu1 %v2287_v18 }
 0x307   :  { %1717 = vmatpush1.bf16.msra.mxu1 %v2291_v29 }
 0x308   :  { %1719 = vmatprep.subr.bf16.mxu1 %v2295_v30 }
 0x30b   :  { %1721 = vmatpush1.bf16.msra.mxu1 %v2299_v41 }
 0x30c   :  { %1723 = vmatprep.subr.bf16.mxu1 %v2303_v46 }
 0x30f   :  { %1725 = vmatpush1.bf16.msra.mxu1 %v2307_v54 }
 0x310   :  { %1727 = vmatprep.subr.bf16.mxu1 %v2311_v55 }
 0x313   :  { %1729 = vmatpush1.bf16.msra.mxu1 %v2315_v2 }
 0x314   :  { %1731 = vmatprep.subr.bf16.mxu1 %v2322_v14 }
 0x317   :  { %1733 = vmatpush1.bf16.msra.mxu1 %v2324_v26 }
 0x318   :  { %1799 = vmatprep.subr.bf16.mxu1 %v2202_v51 }
 0x3ad   :  { %v670_v37 = vpop.f32.mrb[2].mxu1 }
 0x3ae   :  { %v671_v44 = vadd.f32 %v670_v37, %v2138_v58  ;;  %v672_v45 = vpop.f32.mrb[3].mxu1 }
 0x3af   :  { %v673_v62 = vadd.f32 %v672_v45, %v2140_v59 }
 0x3b0   :  { %827 = vmatprep.mubr.f32.mxu0 %v671_v44 }
 0x3b1   :  { %828 = vmatmul.mubr.f32.vlgmr.msra.gmra.mrb[4].mxu0 %v1342_v50  ;;  %v2338_v6 = vadd.f32 %v673_v62, %v2146_v4 }
 0x3b2   :  { %1737 = vmatpush1.bf16.msra.mxu0 %v2204_v63 }
 0x3b3   :  { %677 = vmax.xlane.f32.xlu1 %v2338_v6  ;;  %1739 = vmatprep.subr.bf16.mxu0 %v2206_v5 }
 0x3b6   :  { %1741 = vmatpush1.bf16.msra.mxu0 %v2211_v16 }
 0x3b7   :  { %1743 = vmatprep.subr.bf16.mxu0 %v2215_v17 }
 0x3ba   :  { %1745 = vmatpush1.bf16.msra.mxu0 %v2219_v24 }
 0x3bb   :  { %1747 = vmatprep.subr.bf16.mxu0 %v2223_v27 }
 0x3be   :  { %1749 = vmatpush1.bf16.msra.mxu0 %v2227_v34 }
 0x3bf   :  { %1751 = vmatprep.subr.bf16.mxu0 %v2231_v35 }
 0x3c2   :  { %1753 = vmatpush1.bf16.msra.mxu0 %v2235_v42 }
 0x3c3   :  { %1755 = vmatprep.subr.bf16.mxu0 %v2239_v43 }
 0x3c6   :  { %1757 = vmatpush1.bf16.msra.mxu0 %v2243_v49 }
 0x3c7   :  { %1759 = vmatprep.subr.bf16.mxu0 %v2247_v52 }
 0x3ca   :  { %1761 = vmatpush1.bf16.msra.mxu0 %v2251_v61 }
 0x3cb   :  { %1763 = vmatprep.subr.bf16.mxu0 %v2255_v0 }
 0x3ce   :  { %1765 = vmatpush1.bf16.msra.mxu0 %v2259_v8 }
 0x3cf   :  { %1767 = vmatprep.subr.bf16.mxu0 %v2263_v13 }
 0x3d2   :  { %1769 = vmatpush1.bf16.msra.mxu0 %v2267_v31 }
 0x3d3   :  { %1771 = vmatprep.subr.bf16.mxu0 %v2271_v32 }
 0x3d6   :  { %1773 = vmatpush1.bf16.msra.mxu0 %v2275_v56 }
 0x3d7   :  { %1775 = vmatprep.subr.bf16.mxu0 %v2279_v57 }
 0x3da   :  { %1777 = vmatpush1.bf16.msra.mxu0 %v2283_v15 }
 0x3db   :  { %1779 = vmatprep.subr.bf16.mxu0 %v2287_v18 }
 0x3de   :  { %1781 = vmatpush1.bf16.msra.mxu0 %v2291_v29 }
 0x3df   :  { %1783 = vmatprep.subr.bf16.mxu0 %v2295_v30 }
 0x3e2   :  { %1785 = vmatpush1.bf16.msra.mxu0 %v2299_v41 }
 0x3e3   :  { %1787 = vmatprep.subr.bf16.mxu0 %v2303_v46 }
 0x3e6   :  { %1789 = vmatpush1.bf16.msra.mxu0 %v2307_v54 }
 0x3e7   :  { %1791 = vmatprep.subr.bf16.mxu0 %v2311_v55 }
 0x3ea   :  { %1793 = vmatpush1.bf16.msra.mxu0 %v2315_v2 }
 0x3eb   :  { %1795 = vmatprep.subr.bf16.mxu0 %v2322_v14 }
 0x3ee   :  { %1797 = vmatpush1.bf16.msra.mxu0 %v2324_v26 }
 0x484   :  { %v829_v51 = vpop.f32.mrb[4].mxu0 }
 0x485   :  { %v830_v11 = vadd.f32 %v829_v51, %v2138_v58  ;;  %v831_v12 = vpop.f32.mrb[5].mxu0 }
 0x486   :  { %v832_v22 = vadd.f32 %v831_v12, %v2140_v59 }
 0x487   :  { %986 = vmatprep.mubr.f32.mxu1 %v830_v11 }
 0x488   :  { %987 = vmatmul.mubr.f32.vlgmr.msra.gmra.mrb[4].mxu1 %v1344_v21  ;;  %v835_v23 = vadd.f32 %v832_v22, %v2146_v4 }
 0x489   :  { %1801 = vmatpush1.bf16.msra.mxu1 %v2204_v63 }
 0x48a   :  { %836 = vmax.xlane.f32.xlu0 %v835_v23  ;;  %1803 = vmatprep.subr.bf16.mxu1 %v2206_v5 }
 0x48d   :  { %1805 = vmatpush1.bf16.msra.mxu1 %v2211_v16 }
 0x48e   :  { %1807 = vmatprep.subr.bf16.mxu1 %v2215_v17  ;;  %v1346_v17 = vld [vmem:[%s2455_s0 + $0x30] sm:$0xff] }
 0x491   :  { %1809 = vmatpush1.bf16.msra.mxu1 %v2219_v24 }
 0x492   :  { %1811 = vmatprep.subr.bf16.mxu1 %v2223_v27 }
 0x495   :  { %1813 = vmatpush1.bf16.msra.mxu1 %v2227_v34  ;;  %v202_v34 = vpop.xlane.xlu0 %201 }
 0x496   :  { %1815 = vmatprep.subr.bf16.mxu1 %v2231_v35  ;;  %v203_v35 = vsub.f32 %v2150_v10, %v202_v34 }
 0x499   :  { %1817 = vmatpush1.bf16.msra.mxu1 %v2235_v42  ;;  %v360_v42 = vpop.xlane.xlu0 %359 }
 0x49a   :  { %1819 = vmatprep.subr.bf16.mxu1 %v2239_v43  ;;  %v519_v43 = vpop.xlane.xlu1 %518 }
 0x49d   :  { %1821 = vmatpush1.bf16.msra.mxu1 %v2243_v49  ;;  %v204_v49 = vmul.f32 1.442695, %v203_v35 }
 0x49e   :  { %1823 = vmatprep.subr.bf16.mxu1 %v2247_v52  ;;  %v520_v52 = vsub.f32 %v2199_v38, %v519_v43  ;;  %v678_v9 = vpop.xlane.xlu1 %677 }
 0x49f   :  { %1866 = vpow2.f32 %v204_v49 }
 0x4a1   :  { %1825 = vmatpush1.bf16.msra.mxu1 %v2251_v61 }
 0x4a2   :  { %1827 = vmatprep.subr.bf16.mxu1 %v2255_v0  ;;  %v521_v0 = vmul.f32 1.442695, %v520_v52 }
 0x4a4   :  { %1868 = vpow2.f32 %v521_v0 }
 0x4a5   :  { %1829 = vmatpush1.bf16.msra.mxu1 %v2259_v8 }
 0x4a6   :  { %1831 = vmatprep.subr.bf16.mxu1 %v2263_v13 }
 0x4a9   :  { %1833 = vmatpush1.bf16.msra.mxu1 %v2267_v31 }
 0x4aa   :  { %1835 = vmatprep.subr.bf16.mxu1 %v2271_v32 }
 0x4ad   :  { %1837 = vmatpush1.bf16.msra.mxu1 %v2275_v56  ;;  %v1348_v56 = vld [vmem:[%s2455_s0 + $0x38] sm:$0xff] }
 0x4ae   :  { %1839 = vmatprep.subr.bf16.mxu1 %v2279_v57 }
 0x4b1   :  { %1841 = vmatpush1.bf16.msra.mxu1 %v2283_v15  ;;  %v1867_v15 = vpop.eup %1866 }
 0x4b2   :  { %1843 = vmatprep.subr.bf16.mxu1 %v2287_v18  ;;  %v1869_v18 = vpop.eup %1868 }
 0x4b5   :  { %1845 = vmatpush1.bf16.msra.mxu1 %v2291_v29 }
 0x4b6   :  { %1847 = vmatprep.subr.bf16.mxu1 %v2295_v30 }
 0x4b9   :  { %1849 = vmatpush1.bf16.msra.mxu1 %v2299_v41 }
 0x4ba   :  { %1851 = vmatprep.subr.bf16.mxu1 %v2303_v46 }
 0x4bd   :  { %1853 = vmatpush1.bf16.msra.mxu1 %v2307_v54 }
 0x4be   :  { %1855 = vmatprep.subr.bf16.mxu1 %v2311_v55 }
 0x4c1   :  { %1857 = vmatpush1.bf16.msra.mxu1 %v2315_v2  ;;  %v361_v2 = vsub.f32 %v2190_v20, %v360_v42 }
 0x4c2   :  { %1859 = vmatprep.subr.bf16.mxu1 %v2322_v14  ;;  %v679_v14 = vsub.f32 %v2338_v6, %v678_v9 }
 0x4c3   :  { %v362_v7 = vmul.f32 1.442695, %v361_v2 }
 0x4c4   :  { %v680_v25 = vmul.f32 1.442695, %v679_v14 }
 0x4c5   :  { %1861 = vmatpush1.bf16.msra.mxu1 %v2324_v26 }
 0x517   :  { %v837_v61 = vpop.xlane.xlu0 %836 }
 0x518   :  { %v838_v8 = vsub.f32 %v835_v23, %v837_v61 }
 0x51a   :  { %v839_v10 = vmul.f32 1.442695, %v838_v8 }
 0x51c   :  { %1870 = vpow2.f32 %v839_v10 }
 0x526   :  { %v1871_v28 = vpop.eup %1870 }
 0x55b   :  { %v988_v63 = vpop.f32.mrb[4].mxu1 }
 0x55c   :  { %v989_v5 = vadd.f32 %v988_v63, %v2138_v58  ;;  %v990_v16 = vpop.f32.mrb[5].mxu1 }
 0x55d   :  { %v991_v24 = vadd.f32 %v990_v16, %v2140_v59 }
 0x55e   :  { %1145 = vmatprep.mubr.f32.mxu0 %v989_v5 }
 0x55f   :  { %1146 = vmatmul.mubr.f32.vlgmr.msra.gmra.mrb[6].mxu0 %v1346_v17  ;;  %v994_v27 = vadd.f32 %v991_v24, %v2146_v4 }
 0x561   :  { %995 = vmax.xlane.f32.xlu1 %v994_v27 }
 0x5ee   :  { %v996_v19 = vpop.xlane.xlu1 %995 }
 0x5ef   :  { %v997_v26 = vsub.f32 %v994_v27, %v996_v19 }
 0x5f1   :  { %v998_v62 = vmul.f32 1.442695, %v997_v26 }
 0x632   :  { %v1147_v13 = vpop.f32.mrb[6].mxu0 }
 0x633   :  { %v1148_v31 = vadd.f32 %v1147_v13, %v2138_v58  ;;  %v1149_v32 = vpop.f32.mrb[7].mxu0 }
 0x634   :  { %v1150_v57 = vadd.f32 %v1149_v32, %v2140_v59 }
 0x635   :  { %1304 = vmatprep.mubr.f32.mxu1 %v1148_v31 }
 0x636   :  { %1305 = vmatmul.mubr.f32.vlgmr.msra.gmra.mrb[6].mxu1 %v1348_v56  ;;  %v1153_v38 = vadd.f32 %v1150_v57, %v2146_v4 }
 0x638   :  { %1154 = vmax.xlane.f32.xlu0 %v1153_v38 }
 0x63c   :  { %206 = vadd.xlane.f32.xlu0 %v1867_v15 }
 0x640   :  { %523 = vadd.xlane.f32.xlu0 %v1869_v18 }
 0x644   :  { %841 = vadd.xlane.f32.xlu0 %v1871_v28 }
 0x6c5   :  { %v1155_v29 = vpop.xlane.xlu0 %1154 }
 0x6c6   :  { %v1156_v30 = vsub.f32 %v1153_v38, %v1155_v29 }
 0x6c8   :  { %v1157_v33 = vmul.f32 1.442695, %v1156_v30 }
 0x6c9   :  { %v207_v36 = vpop.xlane.xlu0 %206 }
 0x6ca   :  { %1872 = vpow2.f32 %v1157_v33 }
 0x6cb   :  { %1874 = vlog2.f32 %v207_v36 }
 0x6cd   :  { %v524_v39 = vpop.xlane.xlu0 %523 }
 0x6ce   :  { %1876 = vlog2.f32 %v524_v39 }
 0x6d1   :  { %v842_v40 = vpop.xlane.xlu0 %841 }
 0x6d2   :  { %1878 = vlog2.f32 %v842_v40 }
 0x6d3   :  { %1880 = vpow2.f32 %v362_v7 }
 0x6d4   :  { %v1873_v41 = vpop.eup %1872  ;;  %1882 = vpow2.f32 %v680_v25 }
 0x6d5   :  { %v1875_v46 = vpop.eup %1874  ;;  %1159 = vadd.xlane.f32.xlu0 %v1873_v41  ;;  %1884 = vpow2.f32 %v998_v62 }
 0x6d6   :  { %v209_v47 = vmul.f32 0.6931472, %v1875_v46 }
 0x6d8   :  { %v1877_v48 = vpop.eup %1876  ;;  %v210_v3 = vsub.f32 %v203_v35, %v209_v47 }
 0x6d9   :  { %v526_v53 = vmul.f32 0.6931472, %v1877_v48 }
 0x6da   :  { %211 = vst [vmem:[%s2459_s4] sm:$0xff] %v210_v3 }
 0x6db   :  { %v527_v54 = vsub.f32 %v520_v52, %v526_v53 }
 0x6dc   :  { %v1879_v55 = vpop.eup %1878 }
 0x6dd   :  { %1339 = vst [vmem:[%s2459_s4 + $0x10] sm:$0xff] %v527_v54  ;;  %v844_v60 = vmul.f32 0.6931472, %v1879_v55  ;;  %v1881_v6 = vpop.eup %1880 }
 0x6de   :  { %v1883_v51 = vpop.eup %1882 }
 0x6df   :  { %v845_v1 = vsub.f32 %v838_v8, %v844_v60  ;;  %v1885_v11 = vpop.eup %1884 }
 0x6e1   :  { %1343 = vst [vmem:[%s2459_s4 + $0x20] sm:$0xff] %v845_v1 }
 0x709   :  { %v1306_v37 = vpop.f32.mrb[6].mxu1 }
 0x70a   :  { %v1307_v44 = vadd.f32 %v1306_v37, %v2138_v58  ;;  %v1308_v45 = vpop.f32.mrb[7].mxu1 }
 0x70b   :  { %v1309_v50 = vadd.f32 %v1308_v45, %v2140_v59 }
 0x70c   :  { %1326 = vst [vmem:[%s2460_s5] sm:$0xff] %v1307_v44 }
 0x70d   :  { %v1312_v20 = vadd.f32 %v1309_v50, %v2146_v4 }
 0x70f   :  { %1313 = vmax.xlane.f32.xlu1 %v1312_v20 }
 0x713   :  { %364 = vadd.xlane.f32.xlu1 %v1881_v6 }
 0x717   :  { %682 = vadd.xlane.f32.xlu1 %v1883_v51 }
 0x71b   :  { %1000 = vadd.xlane.f32.xlu1 %v1885_v11 }
 0x762   :  { %v1160_v58 = vpop.xlane.xlu0 %1159 }
 0x763   :  { %1886 = vlog2.f32 %v1160_v58 }
 0x76d   :  { %v1887_v12 = vpop.eup %1886 }
 0x76e   :  { %v1162_v59 = vmul.f32 0.6931472, %v1887_v12 }
 0x770   :  { %v1163_v21 = vsub.f32 %v1156_v30, %v1162_v59 }
 0x772   :  { %1347 = vst [vmem:[%s2459_s4 + $0x30] sm:$0xff] %v1163_v21 }
 0x79c   :  { %v1314_v22 = vpop.xlane.xlu1 %1313 }
 0x79d   :  { %v1315_v23 = vsub.f32 %v1312_v20, %v1314_v22 }
 0x79f   :  { %v1316_v4 = vmul.f32 1.442695, %v1315_v23 }
 0x7a0   :  { %v365_v63 = vpop.xlane.xlu1 %364 }
 0x7a1   :  { %1888 = vpow2.f32 %v1316_v4 }
 0x7a2   :  { %1890 = vlog2.f32 %v365_v63 }
 0x7a4   :  { %v683_v5 = vpop.xlane.xlu1 %682 }
 0x7a5   :  { %1892 = vlog2.f32 %v683_v5 }
 0x7a8   :  { %v1001_v16 = vpop.xlane.xlu1 %1000 }
 0x7a9   :  { %1894 = vlog2.f32 %v1001_v16 }
 0x7ab   :  { %v1889_v17 = vpop.eup %1888 }
 0x7ac   :  { %v1891_v24 = vpop.eup %1890  ;;  %1318 = vadd.xlane.f32.xlu1 %v1889_v17 }
 0x7ad   :  { %v367_v27 = vmul.f32 0.6931472, %v1891_v24 }
 0x7af   :  { %v1893_v34 = vpop.eup %1892  ;;  %v368_v35 = vsub.f32 %v361_v2, %v367_v27 }
 0x7b0   :  { %v685_v42 = vmul.f32 0.6931472, %v1893_v34 }
 0x7b1   :  { %1337 = vst [vmem:[%s2459_s4 + $0x8] sm:$0xff] %v368_v35 }
 0x7b2   :  { %v686_v43 = vsub.f32 %v679_v14, %v685_v42 }
 0x7b3   :  { %v1895_v49 = vpop.eup %1894 }
 0x7b4   :  { %1341 = vst [vmem:[%s2459_s4 + $0x18] sm:$0xff] %v686_v43  ;;  %v1003_v52 = vmul.f32 0.6931472, %v1895_v49 }
 0x7b6   :  { %v1004_v61 = vsub.f32 %v997_v26, %v1003_v52 }
 0x7b8   :  { %1345 = vst [vmem:[%s2459_s4 + $0x28] sm:$0xff] %v1004_v61 }
 0x839   :  { %v1319_v0 = vpop.xlane.xlu1 %1318 }
 0x83a   :  { %1896 = vlog2.f32 %v1319_v0 }
 0x844   :  { %v1897_v8 = vpop.eup %1896 }
 0x845   :  { %v1321_v13 = vmul.f32 0.6931472, %v1897_v8 }
 0x847   :  { %v1322_v31 = vsub.f32 %v1315_v23, %v1321_v13 }
 0x849   :  { %1349 = vst [vmem:[%s2459_s4 + $0x38] sm:$0xff] %v1322_v31 }
 0x84a   :  { %1335 = vsyncpa [#allocation4], 1 }

</bundles_post_ra>
